<compile_context>
chip_gen: v7x
topology: tpu7x:2x2x1
jax: 0.10.0
libtpu: 0.0.40
codegen_flags: <defaults>
</compile_context>

<pallas_src>
import functools

import jax
import jax.numpy as jnp
from jax.experimental import pallas as pl
from jax.experimental.pallas import tpu as pltpu

C_HIDDEN = 1024
N_GROUPS = 16
GRP_SIZE = C_HIDDEN // N_GROUPS
GN_EPS = 1e-5


def _ceil_to(x, m):
    return ((x + m - 1) // m) * m


def _default_vmem_limit_bytes():
    """Per-generation VMEM limit: 3/4 of physical, min 32 MiB, fallback 48 MiB."""
    try:
        cap = int(pltpu.get_tpu_info().vmem_capacity_bytes)
    except Exception:
        cap = 64 * 1024 * 1024
    return max(32 * 1024 * 1024, (cap * 3) // 4)


def s_weight_pool_kernel(src_ref, tgt_ref, w1_ref, par_ref, g_ref, gt_ref,
                         pooled_ref, s_acc, ss_acc, mx_acc, mn_acc, *,
                         n_src, n_tgt, tile_n, nt_src, nt_total,
                         mask_src, mask_tgt):
    # src_ref/tgt_ref: (1, tile_n, emb) f32     w1_ref: (emb, C) bf16
    # par_ref: (4, C) f32 rows = [bias_src, bias_tgt, gamma, beta]
    # g_ref:  (C, G) f32   gt_ref: (G, C) f32
    # pooled_ref: (1, 1, C) f32 (lane-dense), written on the last tile only.
    t = pl.program_id(1)

    @pl.when(t == 0)
    def _init():
        s_acc[...] = jnp.zeros_like(s_acc)
        ss_acc[...] = jnp.zeros_like(ss_acc)
        mx_acc[...] = jnp.full_like(mx_acc, -jnp.inf)
        mn_acc[...] = jnp.full_like(mn_acc, jnp.inf)

    w1 = w1_ref[...]                                        # (emb, C) bf16

    def accumulate(x_ref, bias, n_valid, base_row, needs_mask):
        # One streamed pass over a (tile_n, C) activation tile: matmul + bias,
        # then column sums / sum-of-squares / max / min into the accumulators.
        x = x_ref[0].astype(jnp.bfloat16)                   # (tile_n, emb)
        h = jnp.dot(x, w1, preferred_element_type=jnp.float32) + bias
        if needs_mask:                                      # static flag
            row = jax.lax.broadcasted_iota(jnp.int32, (tile_n, 1), 0)
            valid = (base_row + row) < n_valid              # (tile_n, 1)
            hz = jnp.where(valid, h, 0.0)
            s_t = jnp.sum(hz, axis=0, keepdims=True)
            ss_t = jnp.sum(hz * h, axis=0, keepdims=True)   # pad rows -> 0
            mx_t = jnp.max(jnp.where(valid, h, -jnp.inf), axis=0, keepdims=True)
            mn_t = jnp.min(jnp.where(valid, h, jnp.inf), axis=0, keepdims=True)
        else:
            s_t = jnp.sum(h, axis=0, keepdims=True)
            ss_t = jnp.sum(h * h, axis=0, keepdims=True)
            mx_t = jnp.max(h, axis=0, keepdims=True)
            mn_t = jnp.min(h, axis=0, keepdims=True)
        s_acc[...] += s_t
        ss_acc[...] += ss_t
        mx_acc[...] = jnp.maximum(mx_acc[...], mx_t)
        mn_acc[...] = jnp.minimum(mn_acc[...], mn_t)

    @pl.when(t < nt_src)
    def _src_phase():
        accumulate(src_ref, par_ref[0:1, :], n_src, t * tile_n, mask_src)

    @pl.when(t >= nt_src)
    def _tgt_phase():
        accumulate(tgt_ref, par_ref[1:2, :], n_tgt, (t - nt_src) * tile_n,
                   mask_tgt)

    @pl.when(t == nt_total - 1)
    def _finalize():
        # GroupNorm(16, 1024) stats via channel<->group indicator matmuls.
        # Single-pass variance (E[x^2]-E[x]^2), clamped >= 0 before rsqrt.
        inv_cnt = 1.0 / float((n_src + n_tgt) * GRP_SIZE)   # true point count
        s = s_acc[...]
        ss = ss_acc[...]
        mean_g = jnp.dot(s, g_ref[...], preferred_element_type=jnp.float32) * inv_cnt
        e2_g = jnp.dot(ss, g_ref[...], preferred_element_type=jnp.float32) * inv_cnt
        var_g = jnp.maximum(e2_g - mean_g * mean_g, 0.0)
        inv_g = jax.lax.rsqrt(var_g + GN_EPS)
        mean_c = jnp.dot(mean_g, gt_ref[...], preferred_element_type=jnp.float32)
        inv_c = jnp.dot(inv_g, gt_ref[...], preferred_element_type=jnp.float32)

        # Folded affine + ReLU + AdaptiveMaxPool1d(1), all on (1, C) rows:
        #   max_n relu(s*h + t) = relu(s*max_n h if s>=0 else s*min_n h, + t)
        gamma = par_ref[2:3, :]
        gbeta = par_ref[3:4, :]
        scale = inv_c * gamma
        shift = gbeta - mean_c * scale
        pre = jnp.where(scale >= 0.0, scale * mx_acc[...], scale * mn_acc[...]) + shift
        pooled_ref[0] = jnp.maximum(pre, 0.0)


def s_weight_forward(src, tgt, params, *, tile_n=512):
    """src: (B, n_src, emb) f32, tgt: (B, n_tgt, emb) f32.  Returns beta: (B,)."""
    B, n_src, emb = src.shape
    _, n_tgt, emb2 = tgt.shape
    assert emb == emb2

    # Fold the "+1 indicator" channel of tgt into a tgt-only bias (bf16-rounded
    # indicator row, to match the reference's bf16 matmul exactly).
    w1_bf = params['w1'].astype(jnp.bfloat16)                 # (emb+1, C)
    w1_main = w1_bf[:emb]                                     # (emb, C) bf16
    b_src = params['b1']                                      # (1, C) f32
    b_tgt = params['b1'] + w1_bf[emb:emb + 1].astype(jnp.float32)
    par = jnp.concatenate([b_src, b_tgt, params['gamma'], params['gbeta']],
                          axis=0)                             # (4, C) f32

    # Point-axis tiling: multiples of 8 (256/512 recommended for real sizes).
    tn = min(int(tile_n), _ceil_to(max(n_src, n_tgt), 8))
    tn = max(8, _ceil_to(tn, 8))
    n_src_p = _ceil_to(n_src, tn)
    n_tgt_p = _ceil_to(n_tgt, tn)
    nt_src = n_src_p // tn
    nt_tgt = n_tgt_p // tn
    nt_total = nt_src + nt_tgt
    mask_src = n_src_p != n_src
    mask_tgt = n_tgt_p != n_tgt

    # Only pad the point axis when a ragged tail exists (pad rows are masked
    # out inside the kernel, so they are exactly neutral).
    src_in = src if not mask_src else jnp.pad(src, ((0, 0), (0, n_src_p - n_src), (0, 0)))
    tgt_in = tgt if not mask_tgt else jnp.pad(tgt, ((0, 0), (0, n_tgt_p - n_tgt), (0, 0)))

    # Channel -> group indicator matrix (C, 16) and its transpose (epilogue only).
    ch = jnp.arange(C_HIDDEN)
    gmat = (ch[:, None] // GRP_SIZE == jnp.arange(N_GROUPS)[None, :]).astype(jnp.float32)

    kernel = functools.partial(
        s_weight_pool_kernel,
        n_src=n_src, n_tgt=n_tgt, tile_n=tn, nt_src=nt_src, nt_total=nt_total,
        mask_src=mask_src, mask_tgt=mask_tgt)

    # Clamped index maps: the inactive input's block index never changes, so
    # Pallas skips its re-DMA during the other phase.
    src_map = lambda b, t: (b, jnp.minimum(t, nt_src - 1), 0)
    tgt_map = lambda b, t: (b, jnp.maximum(t - nt_src, 0), 0)

    pooled = pl.pallas_call(
        kernel,
        out_shape=jax.ShapeDtypeStruct((B, 1, C_HIDDEN), jnp.float32),
        grid_spec=pltpu.PrefetchScalarGridSpec(
            num_scalar_prefetch=0,
            grid=(B, nt_total),
            in_specs=[
                pl.BlockSpec((1, tn, emb), src_map),                    # src tile (f32)
                pl.BlockSpec((1, tn, emb), tgt_map),                    # tgt tile (f32)
                pl.BlockSpec((emb, C_HIDDEN), lambda b, t: (0, 0)),     # w1 (bf16)
                pl.BlockSpec((4, C_HIDDEN), lambda b, t: (0, 0)),       # biases/gamma/beta
                pl.BlockSpec((C_HIDDEN, N_GROUPS), lambda b, t: (0, 0)),  # G
                pl.BlockSpec((N_GROUPS, C_HIDDEN), lambda b, t: (0, 0)),  # G^T
            ],
            out_specs=pl.BlockSpec((1, 1, C_HIDDEN), lambda b, t: (b, 0, 0)),
            scratch_shapes=[pltpu.VMEM((1, C_HIDDEN), jnp.float32)] * 4,
        ),
        compiler_params=pltpu.CompilerParams(
            dimension_semantics=("parallel", "arbitrary"),   # batch || ; tiles reduce
            vmem_limit_bytes=_default_vmem_limit_bytes(),
        ),
    )(src_in, tgt_in, w1_main, par, gmat, gmat.T)

    pooled = pooled[:, 0, :]                                  # (B, 1024) lane-dense

    # Post-pool MLP + softplus: negligible FLOPs -> plain XLA (keeps w2/w3 out
    # of kernel VMEM).
    z = pooled @ params['w2'] + params['b2']
    z = z @ params['w3'] + params['b3']
    z = z @ params['w4'].T + params['b4']
    return jax.nn.softplus(z[:, 0])


def s_weight_reference(src, tgt, params):
    """Pure-JAX reference mirroring the PyTorch forward (pad/concat path).

    Uses the same bf16 quantization of the conv inputs as the kernel so the
    comparison isolates the kernel's algebraic rewrites."""
    src_p = jnp.pad(src, ((0, 0), (0, 0), (0, 1)), constant_values=0.0)
    tgt_p = jnp.pad(tgt, ((0, 0), (0, 0), (0, 1)), constant_values=1.0)
    x = jnp.concatenate([src_p, tgt_p], axis=1)               # (B, N, emb+1)
    h = jnp.einsum('bnc,cd->bnd', x.astype(jnp.bfloat16),
                   params['w1'].astype(jnp.bfloat16),
                   preferred_element_type=jnp.float32) + params['b1'][None]
    B, N, C = h.shape
    hg = h.reshape(B, N, N_GROUPS, C // N_GROUPS)
    mean = hg.mean(axis=(1, 3), keepdims=True)
    var = ((hg - mean) ** 2).mean(axis=(1, 3), keepdims=True)
    hn = (hg - mean) / jnp.sqrt(var + GN_EPS)
    hn = hn.reshape(B, N, C) * params['gamma'][None] + params['gbeta'][None]
    hr = jnp.maximum(hn, 0.0)
    pooled = hr.max(axis=1)                                   # (B, C)
    z = pooled @ params['w2'] + params['b2']
    z = z @ params['w3'] + params['b3']
    z = z @ params['w4'].T + params['b4']
    return jax.nn.softplus(z[:, 0])


def init_params(key, emb_dims):
    cin = emb_dims + 1

    def uni(k, shape, fan_in):
        bound = 1.0 / jnp.sqrt(jnp.float32(fan_in))
        return jax.random.uniform(k, shape, jnp.float32, -bound, bound)

    ks = jax.random.split(key, 10)
    return {
        'w1': uni(ks[0], (cin, C_HIDDEN), cin),           # Conv1d(cin,1024,1) weight^T
        'b1': uni(ks[1], (1, C_HIDDEN), cin),
        # PyTorch GroupNorm default init is ones/zeros; randomized here (with
        # mixed signs) so both pooling branches (max / min) are exercised.
        'gamma': jax.random.normal(ks[8], (1, C_HIDDEN), jnp.float32),
        'gbeta': 0.1 * jax.random.normal(ks[9], (1, C_HIDDEN), jnp.float32),
        'w2': uni(ks[2], (C_HIDDEN, 512), C_HIDDEN),      # Linear(1024,512) weight^T
        'b2': uni(ks[3], (1, 512), C_HIDDEN),
        'w3': uni(ks[4], (512, 256), 512),                # Linear(512,256) weight^T
        'b3': uni(ks[5], (1, 256), 512),
        'w4': uni(ks[6], (1, 256), 256),                  # Linear(256,1) weight
        'b4': uni(ks[7], (1, 1), 256),
    }


if __name__ == "__main__":
    key = jax.random.PRNGKey(0)
    k1, k2, k3, k4, k5 = jax.random.split(key, 5)
    fwd = jax.jit(s_weight_forward, static_argnames=("tile_n",))

    # Config A: multi-tile streaming over the point axis (no pad masking).
    B, NS, NT, EMB = 2, 16, 16, 32     # small test shapes; hidden dims fixed by module
    src = jax.random.normal(k1, (B, NS, EMB), jnp.float32)
    tgt = jax.random.normal(k2, (B, NT, EMB), jnp.float32)
    params = init_params(k3, EMB)
    beta = jax.block_until_ready(fwd(src, tgt, params, tile_n=8))
    beta_ref = jax.block_until_ready(s_weight_reference(src, tgt, params))
    assert beta.shape == (B,), beta.shape
    assert jnp.allclose(beta, beta_ref, rtol=2e-3, atol=2e-3), (beta, beta_ref)

    # Config B: uneven point counts -> exercises the in-kernel tail masking.
    NS2, NT2 = 12, 20
    src2 = jax.random.normal(k4, (B, NS2, EMB), jnp.float32)
    tgt2 = jax.random.normal(k5, (B, NT2, EMB), jnp.float32)
    beta2 = jax.block_until_ready(fwd(src2, tgt2, params, tile_n=16))
    beta2_ref = jax.block_until_ready(s_weight_reference(src2, tgt2, params))
    assert beta2.shape == (B,), beta2.shape
    assert jnp.allclose(beta2, beta2_ref, rtol=2e-3, atol=2e-3), (beta2, beta2_ref)

    print("KERNEL_OK")
</pallas_src>

<mosaic_0001>
module attributes {stable_mosaic.version = 11 : i64} {
  func.func @s_weight_pool_kernel(%arg0: i32, %arg1: i32, %arg2: memref<1x8x32xf32, #tpu.memory_space<vmem>>, %arg3: memref<1x8x32xf32, #tpu.memory_space<vmem>>, %arg4: memref<32x1024xbf16, #tpu.memory_space<vmem>>, %arg5: memref<4x1024xf32, #tpu.memory_space<vmem>>, %arg6: memref<1024x16xf32, #tpu.memory_space<vmem>>, %arg7: memref<16x1024xf32, #tpu.memory_space<vmem>>, %arg8: memref<1x1x1024xf32, #tpu.memory_space<vmem>>, %arg9: memref<1x1024xf32, #tpu.memory_space<vmem>>, %arg10: memref<1x1024xf32, #tpu.memory_space<vmem>>, %arg11: memref<1x1024xf32, #tpu.memory_space<vmem>>, %arg12: memref<1x1024xf32, #tpu.memory_space<vmem>>) attributes {dimension_semantics = [#tpu.dimension_semantics<parallel>, #tpu.dimension_semantics<arbitrary>], iteration_bounds = array<i64: 2, 4>, scalar_prefetch = 0 : i64, scratch_operands = 4 : i64, tpu.core_type = #tpu.core_type<tc>, window_params = [{transform_indices = @transform_0, window_bounds = array<i64: 1, 8, 32>}, {transform_indices = @transform_1, window_bounds = array<i64: 1, 8, 32>}, {pipeline_mode = #tpu.pipeline_mode<synchronous>, transform_indices = @transform_2, window_bounds = array<i64: 32, 1024>}, {pipeline_mode = #tpu.pipeline_mode<synchronous>, transform_indices = @transform_3, window_bounds = array<i64: 4, 1024>}, {pipeline_mode = #tpu.pipeline_mode<synchronous>, transform_indices = @transform_4, window_bounds = array<i64: 1024, 16>}, {pipeline_mode = #tpu.pipeline_mode<synchronous>, transform_indices = @transform_5, window_bounds = array<i64: 16, 1024>}, {transform_indices = @transform_6, window_bounds = array<i64: 1, 1, 1024>}]} {
    %c0_i32 = arith.constant 0 : i32
    %0 = arith.cmpi eq, %arg1, %c0_i32 : i32
    %1 = arith.extui %0 : i1 to i32
    %c0_i32_0 = arith.constant 0 : i32
    %2 = arith.cmpi ne, %1, %c0_i32_0 : i32
    scf.if %2 {
      %cst = arith.constant 0.000000e+00 : f32
      %13 = vector.broadcast %cst : f32 to vector<1x1024xf32>
      %c0_6 = arith.constant 0 : index
      %c0_7 = arith.constant 0 : index
      %14 = vector.load %arg9[%c0_6, %c0_7] : memref<1x1024xf32, #tpu.memory_space<vmem>>, vector<1x1024xf32>
      tpu.vector_store %arg9[%c0_6, %c0_7], %13 {strides = array<i32>} : memref<1x1024xf32, #tpu.memory_space<vmem>>, vector<1x1024xf32>,
      %cst_8 = arith.constant 0.000000e+00 : f32
      %15 = vector.broadcast %cst_8 : f32 to vector<1x1024xf32>
      %c0_9 = arith.constant 0 : index
      %c0_10 = arith.constant 0 : index
      %16 = vector.load %arg10[%c0_9, %c0_10] : memref<1x1024xf32, #tpu.memory_space<vmem>>, vector<1x1024xf32>
      tpu.vector_store %arg10[%c0_9, %c0_10], %15 {strides = array<i32>} : memref<1x1024xf32, #tpu.memory_space<vmem>>, vector<1x1024xf32>,
      %cst_11 = arith.constant 0xFF800000 : f32
      %17 = vector.broadcast %cst_11 : f32 to vector<1x1024xf32>
      %c0_12 = arith.constant 0 : index
      %c0_13 = arith.constant 0 : index
      %18 = vector.load %arg11[%c0_12, %c0_13] : memref<1x1024xf32, #tpu.memory_space<vmem>>, vector<1x1024xf32>
      tpu.vector_store %arg11[%c0_12, %c0_13], %17 {strides = array<i32>} : memref<1x1024xf32, #tpu.memory_space<vmem>>, vector<1x1024xf32>,
      %cst_14 = arith.constant 0x7F800000 : f32
      %19 = vector.broadcast %cst_14 : f32 to vector<1x1024xf32>
      %c0_15 = arith.constant 0 : index
      %c0_16 = arith.constant 0 : index
      %20 = vector.load %arg12[%c0_15, %c0_16] : memref<1x1024xf32, #tpu.memory_space<vmem>>, vector<1x1024xf32>
      tpu.vector_store %arg12[%c0_15, %c0_16], %19 {strides = array<i32>} : memref<1x1024xf32, #tpu.memory_space<vmem>>, vector<1x1024xf32>,
    } else {
    }
    %c0 = arith.constant 0 : index
    %c0_1 = arith.constant 0 : index
    %3 = vector.load %arg4[%c0, %c0_1] : memref<32x1024xbf16, #tpu.memory_space<vmem>>, vector<32x1024xbf16>
    %c2_i32 = arith.constant 2 : i32
    %4 = arith.cmpi slt, %arg1, %c2_i32 : i32
    %5 = arith.extui %4 : i1 to i32
    %c0_i32_2 = arith.constant 0 : i32
    %6 = arith.cmpi ne, %5, %c0_i32_2 : i32
    scf.if %6 {
      %c0_6 = arith.constant 0 : index
      %c0_7 = arith.constant 0 : index
      %13 = vector.load %arg5[%c0_6, %c0_7] : memref<4x1024xf32, #tpu.memory_space<vmem>>, vector<1x1024xf32>
      %c0_8 = arith.constant 0 : index
      %c0_9 = arith.constant 0 : index
      %c0_10 = arith.constant 0 : index
      %14 = vector.load %arg2[%c0_8, %c0_9, %c0_10] : memref<1x8x32xf32, #tpu.memory_space<vmem>>, vector<1x8x32xf32>
      %15 = vector.shape_cast %14 : vector<1x8x32xf32> to vector<8x32xf32>
      %16 = arith.truncf %15 : vector<8x32xf32> to vector<8x32xbf16>
      %cst = arith.constant dense<0.000000e+00> : vector<8x1024xf32>
      %17 = tpu.matmul %16, %3, %cst {dimension_numbers = #tpu.dot_dimension_numbers<[1], [0], [0], [1], [0, 0, 1, 1], [], []>} : vector<8x32xbf16>, vector<32x1024xbf16>, vector<8x1024xf32> -> vector<8x1024xf32>
      %18 = vector.broadcast %13 : vector<1x1024xf32> to vector<8x1024xf32>
      %19 = arith.addf %17, %18 : vector<8x1024xf32>
      %cst_11 = arith.constant dense<0.000000e+00> : vector<1024xf32>
      %20 = vector.multi_reduction <add>, %19, %cst_11 [0] : vector<8x1024xf32> to vector<1024xf32>
      %21 = vector.shape_cast %20 : vector<1024xf32> to vector<1x1024xf32>
      %22 = arith.mulf %19, %19 : vector<8x1024xf32>
      %cst_12 = arith.constant dense<0.000000e+00> : vector<1024xf32>
      %23 = vector.multi_reduction <add>, %22, %cst_12 [0] : vector<8x1024xf32> to vector<1024xf32>
      %24 = vector.shape_cast %23 : vector<1024xf32> to vector<1x1024xf32>
      %cst_13 = arith.constant dense<0xFF800000> : vector<1024xf32>
      %25 = vector.multi_reduction <maximumf>, %19, %cst_13 [0] : vector<8x1024xf32> to vector<1024xf32>
      %26 = vector.shape_cast %25 : vector<1024xf32> to vector<1x1024xf32>
      %cst_14 = arith.constant dense<0x7F800000> : vector<1024xf32>
      %27 = vector.multi_reduction <minimumf>, %19, %cst_14 [0] : vector<8x1024xf32> to vector<1024xf32>
      %28 = vector.shape_cast %27 : vector<1024xf32> to vector<1x1024xf32>
      %c0_15 = arith.constant 0 : index
      %c0_16 = arith.constant 0 : index
      %29 = vector.load %arg9[%c0_15, %c0_16] : memref<1x1024xf32, #tpu.memory_space<vmem>>, vector<1x1024xf32>
      %30 = arith.addf %29, %21 : vector<1x1024xf32>
      %c0_17 = arith.constant 0 : index
      %c0_18 = arith.constant 0 : index
      %31 = vector.load %arg9[%c0_17, %c0_18] : memref<1x1024xf32, #tpu.memory_space<vmem>>, vector<1x1024xf32>
      tpu.vector_store %arg9[%c0_17, %c0_18], %30 {strides = array<i32>} : memref<1x1024xf32, #tpu.memory_space<vmem>>, vector<1x1024xf32>,
      %c0_19 = arith.constant 0 : index
      %c0_20 = arith.constant 0 : index
      %32 = vector.load %arg10[%c0_19, %c0_20] : memref<1x1024xf32, #tpu.memory_space<vmem>>, vector<1x1024xf32>
      %33 = arith.addf %32, %24 : vector<1x1024xf32>
      %c0_21 = arith.constant 0 : index
      %c0_22 = arith.constant 0 : index
      %34 = vector.load %arg10[%c0_21, %c0_22] : memref<1x1024xf32, #tpu.memory_space<vmem>>, vector<1x1024xf32>
      tpu.vector_store %arg10[%c0_21, %c0_22], %33 {strides = array<i32>} : memref<1x1024xf32, #tpu.memory_space<vmem>>, vector<1x1024xf32>,
      %c0_23 = arith.constant 0 : index
      %c0_24 = arith.constant 0 : index
      %35 = vector.load %arg11[%c0_23, %c0_24] : memref<1x1024xf32, #tpu.memory_space<vmem>>, vector<1x1024xf32>
      %36 = arith.maximumf %35, %26 : vector<1x1024xf32>
      %c0_25 = arith.constant 0 : index
      %c0_26 = arith.constant 0 : index
      %37 = vector.load %arg11[%c0_25, %c0_26] : memref<1x1024xf32, #tpu.memory_space<vmem>>, vector<1x1024xf32>
      tpu.vector_store %arg11[%c0_25, %c0_26], %36 {strides = array<i32>} : memref<1x1024xf32, #tpu.memory_space<vmem>>, vector<1x1024xf32>,
      %c0_27 = arith.constant 0 : index
      %c0_28 = arith.constant 0 : index
      %38 = vector.load %arg12[%c0_27, %c0_28] : memref<1x1024xf32, #tpu.memory_space<vmem>>, vector<1x1024xf32>
      %39 = arith.minimumf %38, %28 : vector<1x1024xf32>
      %c0_29 = arith.constant 0 : index
      %c0_30 = arith.constant 0 : index
      %40 = vector.load %arg12[%c0_29, %c0_30] : memref<1x1024xf32, #tpu.memory_space<vmem>>, vector<1x1024xf32>
      tpu.vector_store %arg12[%c0_29, %c0_30], %39 {strides = array<i32>} : memref<1x1024xf32, #tpu.memory_space<vmem>>, vector<1x1024xf32>,
    } else {
    }
    %c2_i32_3 = arith.constant 2 : i32
    %7 = arith.cmpi sge, %arg1, %c2_i32_3 : i32
    %8 = arith.extui %7 : i1 to i32
    %c0_i32_4 = arith.constant 0 : i32
    %9 = arith.cmpi ne, %8, %c0_i32_4 : i32
    scf.if %9 {
      %c1 = arith.constant 1 : index
      %c0_6 = arith.constant 0 : index
      %13 = vector.load %arg5[%c1, %c0_6] : memref<4x1024xf32, #tpu.memory_space<vmem>>, vector<1x1024xf32>
      %c0_7 = arith.constant 0 : index
      %c0_8 = arith.constant 0 : index
      %c0_9 = arith.constant 0 : index
      %14 = vector.load %arg3[%c0_7, %c0_8, %c0_9] : memref<1x8x32xf32, #tpu.memory_space<vmem>>, vector<1x8x32xf32>
      %15 = vector.shape_cast %14 : vector<1x8x32xf32> to vector<8x32xf32>
      %16 = arith.truncf %15 : vector<8x32xf32> to vector<8x32xbf16>
      %cst = arith.constant dense<0.000000e+00> : vector<8x1024xf32>
      %17 = tpu.matmul %16, %3, %cst {dimension_numbers = #tpu.dot_dimension_numbers<[1], [0], [0], [1], [0, 0, 1, 1], [], []>} : vector<8x32xbf16>, vector<32x1024xbf16>, vector<8x1024xf32> -> vector<8x1024xf32>
      %18 = vector.broadcast %13 : vector<1x1024xf32> to vector<8x1024xf32>
      %19 = arith.addf %17, %18 : vector<8x1024xf32>
      %cst_10 = arith.constant dense<0.000000e+00> : vector<1024xf32>
      %20 = vector.multi_reduction <add>, %19, %cst_10 [0] : vector<8x1024xf32> to vector<1024xf32>
      %21 = vector.shape_cast %20 : vector<1024xf32> to vector<1x1024xf32>
      %22 = arith.mulf %19, %19 : vector<8x1024xf32>
      %cst_11 = arith.constant dense<0.000000e+00> : vector<1024xf32>
      %23 = vector.multi_reduction <add>, %22, %cst_11 [0] : vector<8x1024xf32> to vector<1024xf32>
      %24 = vector.shape_cast %23 : vector<1024xf32> to vector<1x1024xf32>
      %cst_12 = arith.constant dense<0xFF800000> : vector<1024xf32>
      %25 = vector.multi_reduction <maximumf>, %19, %cst_12 [0] : vector<8x1024xf32> to vector<1024xf32>
      %26 = vector.shape_cast %25 : vector<1024xf32> to vector<1x1024xf32>
      %cst_13 = arith.constant dense<0x7F800000> : vector<1024xf32>
      %27 = vector.multi_reduction <minimumf>, %19, %cst_13 [0] : vector<8x1024xf32> to vector<1024xf32>
      %28 = vector.shape_cast %27 : vector<1024xf32> to vector<1x1024xf32>
      %c0_14 = arith.constant 0 : index
      %c0_15 = arith.constant 0 : index
      %29 = vector.load %arg9[%c0_14, %c0_15] : memref<1x1024xf32, #tpu.memory_space<vmem>>, vector<1x1024xf32>
      %30 = arith.addf %29, %21 : vector<1x1024xf32>
      %c0_16 = arith.constant 0 : index
      %c0_17 = arith.constant 0 : index
      %31 = vector.load %arg9[%c0_16, %c0_17] : memref<1x1024xf32, #tpu.memory_space<vmem>>, vector<1x1024xf32>
      tpu.vector_store %arg9[%c0_16, %c0_17], %30 {strides = array<i32>} : memref<1x1024xf32, #tpu.memory_space<vmem>>, vector<1x1024xf32>,
      %c0_18 = arith.constant 0 : index
      %c0_19 = arith.constant 0 : index
      %32 = vector.load %arg10[%c0_18, %c0_19] : memref<1x1024xf32, #tpu.memory_space<vmem>>, vector<1x1024xf32>
      %33 = arith.addf %32, %24 : vector<1x1024xf32>
      %c0_20 = arith.constant 0 : index
      %c0_21 = arith.constant 0 : index
      %34 = vector.load %arg10[%c0_20, %c0_21] : memref<1x1024xf32, #tpu.memory_space<vmem>>, vector<1x1024xf32>
      tpu.vector_store %arg10[%c0_20, %c0_21], %33 {strides = array<i32>} : memref<1x1024xf32, #tpu.memory_space<vmem>>, vector<1x1024xf32>,
      %c0_22 = arith.constant 0 : index
      %c0_23 = arith.constant 0 : index
      %35 = vector.load %arg11[%c0_22, %c0_23] : memref<1x1024xf32, #tpu.memory_space<vmem>>, vector<1x1024xf32>
      %36 = arith.maximumf %35, %26 : vector<1x1024xf32>
      %c0_24 = arith.constant 0 : index
      %c0_25 = arith.constant 0 : index
      %37 = vector.load %arg11[%c0_24, %c0_25] : memref<1x1024xf32, #tpu.memory_space<vmem>>, vector<1x1024xf32>
      tpu.vector_store %arg11[%c0_24, %c0_25], %36 {strides = array<i32>} : memref<1x1024xf32, #tpu.memory_space<vmem>>, vector<1x1024xf32>,
      %c0_26 = arith.constant 0 : index
      %c0_27 = arith.constant 0 : index
      %38 = vector.load %arg12[%c0_26, %c0_27] : memref<1x1024xf32, #tpu.memory_space<vmem>>, vector<1x1024xf32>
      %39 = arith.minimumf %38, %28 : vector<1x1024xf32>
      %c0_28 = arith.constant 0 : index
      %c0_29 = arith.constant 0 : index
      %40 = vector.load %arg12[%c0_28, %c0_29] : memref<1x1024xf32, #tpu.memory_space<vmem>>, vector<1x1024xf32>
      tpu.vector_store %arg12[%c0_28, %c0_29], %39 {strides = array<i32>} : memref<1x1024xf32, #tpu.memory_space<vmem>>, vector<1x1024xf32>,
    } else {
    }
    %c3_i32 = arith.constant 3 : i32
    %10 = arith.cmpi eq, %arg1, %c3_i32 : i32
    %11 = arith.extui %10 : i1 to i32
    %c0_i32_5 = arith.constant 0 : i32
    %12 = arith.cmpi ne, %11, %c0_i32_5 : i32
    scf.if %12 {
      %c0_6 = arith.constant 0 : index
      %c0_7 = arith.constant 0 : index
      %13 = vector.load %arg9[%c0_6, %c0_7] : memref<1x1024xf32, #tpu.memory_space<vmem>>, vector<1x1024xf32>
      %c0_8 = arith.constant 0 : index
      %c0_9 = arith.constant 0 : index
      %14 = vector.load %arg10[%c0_8, %c0_9] : memref<1x1024xf32, #tpu.memory_space<vmem>>, vector<1x1024xf32>
      %c0_10 = arith.constant 0 : index
      %c0_11 = arith.constant 0 : index
      %15 = vector.load %arg6[%c0_10, %c0_11] : memref<1024x16xf32, #tpu.memory_space<vmem>>, vector<1024x16xf32>
      %cst = arith.constant dense<0.000000e+00> : vector<1x16xf32>
      %16 = tpu.matmul %13, %15, %cst {dimension_numbers = #tpu.dot_dimension_numbers<[1], [0], [0], [1], [0, 0, 1, 1], [], []>} : vector<1x1024xf32>, vector<1024x16xf32>, vector<1x16xf32> -> vector<1x16xf32>
      %cst_12 = arith.constant 4.8828125E-4 : f32
      %17 = vector.broadcast %cst_12 : f32 to vector<1x16xf32>
      %18 = arith.mulf %16, %17 : vector<1x16xf32>
      %c0_13 = arith.constant 0 : index
      %c0_14 = arith.constant 0 : index
      %19 = vector.load %arg6[%c0_13, %c0_14] : memref<1024x16xf32, #tpu.memory_space<vmem>>, vector<1024x16xf32>
      %cst_15 = arith.constant dense<0.000000e+00> : vector<1x16xf32>
      %20 = tpu.matmul %14, %19, %cst_15 {dimension_numbers = #tpu.dot_dimension_numbers<[1], [0], [0], [1], [0, 0, 1, 1], [], []>} : vector<1x1024xf32>, vector<1024x16xf32>, vector<1x16xf32> -> vector<1x16xf32>
      %cst_16 = arith.constant 4.8828125E-4 : f32
      %21 = vector.broadcast %cst_16 : f32 to vector<1x16xf32>
      %22 = arith.mulf %20, %21 : vector<1x16xf32>
      %23 = arith.mulf %18, %18 : vector<1x16xf32>
      %24 = arith.subf %22, %23 : vector<1x16xf32>
      %cst_17 = arith.constant 0.000000e+00 : f32
      %25 = vector.broadcast %cst_17 : f32 to vector<1x16xf32>
      %26 = arith.maximumf %24, %25 : vector<1x16xf32>
      %cst_18 = arith.constant 9.99999974E-6 : f32
      %27 = vector.broadcast %cst_18 : f32 to vector<1x16xf32>
      %28 = arith.addf %26, %27 : vector<1x16xf32>
      %29 = math.rsqrt %28 : vector<1x16xf32>
      %c0_19 = arith.constant 0 : index
      %c0_20 = arith.constant 0 : index
      %30 = vector.load %arg7[%c0_19, %c0_20] : memref<16x1024xf32, #tpu.memory_space<vmem>>, vector<16x1024xf32>
      %cst_21 = arith.constant dense<0.000000e+00> : vector<1x1024xf32>
      %31 = tpu.matmul %18, %30, %cst_21 {dimension_numbers = #tpu.dot_dimension_numbers<[1], [0], [0], [1], [0, 0, 1, 1], [], []>} : vector<1x16xf32>, vector<16x1024xf32>, vector<1x1024xf32> -> vector<1x1024xf32>
      %c0_22 = arith.constant 0 : index
      %c0_23 = arith.constant 0 : index
      %32 = vector.load %arg7[%c0_22, %c0_23] : memref<16x1024xf32, #tpu.memory_space<vmem>>, vector<16x1024xf32>
      %cst_24 = arith.constant dense<0.000000e+00> : vector<1x1024xf32>
      %33 = tpu.matmul %29, %32, %cst_24 {dimension_numbers = #tpu.dot_dimension_numbers<[1], [0], [0], [1], [0, 0, 1, 1], [], []>} : vector<1x16xf32>, vector<16x1024xf32>, vector<1x1024xf32> -> vector<1x1024xf32>
      %c2 = arith.constant 2 : index
      %c0_25 = arith.constant 0 : index
      %34 = vector.load %arg5[%c2, %c0_25] : memref<4x1024xf32, #tpu.memory_space<vmem>>, vector<1x1024xf32>
      %c3 = arith.constant 3 : index
      %c0_26 = arith.constant 0 : index
      %35 = vector.load %arg5[%c3, %c0_26] : memref<4x1024xf32, #tpu.memory_space<vmem>>, vector<1x1024xf32>
      %36 = arith.mulf %33, %34 : vector<1x1024xf32>
      %37 = arith.mulf %31, %36 : vector<1x1024xf32>
      %38 = arith.subf %35, %37 : vector<1x1024xf32>
      %cst_27 = arith.constant 0.000000e+00 : f32
      %39 = vector.broadcast %cst_27 : f32 to vector<1x1024xf32>
      %40 = arith.cmpf oge, %36, %39 : vector<1x1024xf32>
      %c0_28 = arith.constant 0 : index
      %c0_29 = arith.constant 0 : index
      %41 = vector.load %arg11[%c0_28, %c0_29] : memref<1x1024xf32, #tpu.memory_space<vmem>>, vector<1x1024xf32>
      %42 = arith.mulf %36, %41 : vector<1x1024xf32>
      %c0_30 = arith.constant 0 : index
      %c0_31 = arith.constant 0 : index
      %43 = vector.load %arg12[%c0_30, %c0_31] : memref<1x1024xf32, #tpu.memory_space<vmem>>, vector<1x1024xf32>
      %44 = arith.mulf %36, %43 : vector<1x1024xf32>
      %45 = arith.select %40, %42, %44 : vector<1x1024xi1>, vector<1x1024xf32>
      %46 = arith.addf %45, %38 : vector<1x1024xf32>
      %cst_32 = arith.constant 0.000000e+00 : f32
      %47 = vector.broadcast %cst_32 : f32 to vector<1x1024xf32>
      %48 = arith.maximumf %46, %47 : vector<1x1024xf32>
      %c0_33 = arith.constant 0 : index
      %c0_34 = arith.constant 0 : index
      %c0_35 = arith.constant 0 : index
      %49 = vector.load %arg8[%c0_33, %c0_34, %c0_35] : memref<1x1x1024xf32, #tpu.memory_space<vmem>>, vector<1x1x1024xf32>
      %50 = vector.shape_cast %49 : vector<1x1x1024xf32> to vector<1x1024xf32>
      %51 = vector.shape_cast %48 : vector<1x1024xf32> to vector<1x1x1024xf32>
      tpu.vector_store %arg8[%c0_33, %c0_34, %c0_35], %51 {strides = array<i32>} : memref<1x1x1024xf32, #tpu.memory_space<vmem>>, vector<1x1x1024xf32>,
    } else {
    }
    return
  }
  func.func @transform_0(%arg0: i32, %arg1: i32) -> (i32, i32, i32) {
    %c1_i32 = arith.constant 1 : i32
    %0 = arith.minsi %arg1, %c1_i32 : i32
    %c0_i32 = arith.constant 0 : i32
    %c0_i32_0 = arith.constant 0 : i32
    return %arg0, %0, %c0_i32 : i32, i32, i32
  }
  func.func @transform_1(%arg0: i32, %arg1: i32) -> (i32, i32, i32) {
    %c2_i32 = arith.constant 2 : i32
    %0 = arith.subi %arg1, %c2_i32 : i32
    %c0_i32 = arith.constant 0 : i32
    %1 = arith.maxsi %0, %c0_i32 : i32
    %c0_i32_0 = arith.constant 0 : i32
    %c0_i32_1 = arith.constant 0 : i32
    return %arg0, %1, %c0_i32_0 : i32, i32, i32
  }
  func.func @transform_2(%arg0: i32, %arg1: i32) -> (i32, i32) {
    %c0_i32 = arith.constant 0 : i32
    %c0_i32_0 = arith.constant 0 : i32
    %c0_i32_1 = arith.constant 0 : i32
    return %c0_i32, %c0_i32_0 : i32, i32
  }
  func.func @transform_3(%arg0: i32, %arg1: i32) -> (i32, i32) {
    %c0_i32 = arith.constant 0 : i32
    %c0_i32_0 = arith.constant 0 : i32
    %c0_i32_1 = arith.constant 0 : i32
    return %c0_i32, %c0_i32_0 : i32, i32
  }
  func.func @transform_4(%arg0: i32, %arg1: i32) -> (i32, i32) {
    %c0_i32 = arith.constant 0 : i32
    %c0_i32_0 = arith.constant 0 : i32
    %c0_i32_1 = arith.constant 0 : i32
    return %c0_i32, %c0_i32_0 : i32, i32
  }
  func.func @transform_5(%arg0: i32, %arg1: i32) -> (i32, i32) {
    %c0_i32 = arith.constant 0 : i32
    %c0_i32_0 = arith.constant 0 : i32
    %c0_i32_1 = arith.constant 0 : i32
    return %c0_i32, %c0_i32_0 : i32, i32
  }
  func.func @transform_6(%arg0: i32, %arg1: i32) -> (i32, i32, i32) {
    %c0_i32 = arith.constant 0 : i32
    %c0_i32_0 = arith.constant 0 : i32
    %c0_i32_1 = arith.constant 0 : i32
    return %arg0, %c0_i32, %c0_i32_0 : i32, i32, i32
  }
}

</mosaic_0001>

<bundles_post_ra>
// kernel: s_weight_forward.1
= control target key start
LH: loop header
LB: loop body
LE: loop exit
PB: predicated region body
PF: predicated region fallthrough
CT: control target
= control target key end

     0   :  { %s6206_s0 = inlined_call_operand.hbm [shape: f32[2,16,32], index: 0, kind: input, shape index: {}]   ;;  %s6207_s1 = inlined_call_operand.hbm [shape: f32[2,16,32], index: 1, kind: input, shape index: {}]   ;;  %s6208_s2 = inlined_call_operand.vmem [shape: bf16[32,1024], index: 2, kind: input, shape index: {}]   ;;  %s6209_s3 = inlined_call_operand.vmem [shape: f32[4,1024], index: 3, kind: input, shape index: {}]   ;;  %s6210_s4 = inlined_call_operand.vmem [shape: f32[1024,16], index: 4, kind: input, shape index: {}]   ;;  %s6211_s5 = inlined_call_operand.vmem [shape: f32[16,1024], index: 5, kind: input, shape index: {}]   ;;  %s6212_s6 = inlined_call_operand.vmem [shape: f32[2,1,1024], index: 6, kind: output, shape index: {}]  }
   0x1   :  { %6245 = sst [smem:[#allocation33_spill]] %s6206_s0 }
   0x2   :  { %6246 = sst [smem:[#allocation34_spill]] %s6208_s2 }
   0x3   :  { %6247 = sst [smem:[#allocation35_spill]] %s6209_s3 }
   0x4   :  { %6248 = sst [smem:[#allocation36_spill]] %s6210_s4 }
   0x5   :  { %6249 = sst [smem:[#allocation37_spill]] %s6211_s5 }
   0x6   :  { %11 = vsyncpa [#allocation7], 0 }
   0x7   :  { %13 = vsyncpa [#allocation7 + $0x1], 0 }
   0x8   :  { %14 = vsyncpa [#allocation9], 0 }
   0x9   :  { %16 = vsyncpa [#allocation9 + $0x1], 0  ;;  %s4634_s21 = smov 0   ;;  %s4636_s22 = smov 0  }
   0xa   :  { %s4638_s23 = smov 0   ;;  %s4640_s24 = smov 0  }
   0xb   :  { %s4642_s25 = smov 0   ;;  %s4644_s26 = smov 0  }
   0xc   :  { %s4646_s27 = smov 0   ;;  %s4648_s28 = smov 0  }
   0xd   :  { %s4650_s29 = smov 0   ;;  %s4652_s30 = smov 0  }
   0xe   :  { %s4654_s7 = smov 0  }
   0xf LB: > { %s3679_s8 = sadd.s32 4294967295, %s4586_s7   ;;  %s31_s9 = sadd.s32 1, %s4578_s29  ;;  %s4586_s7 = sphi %s4654_s7, %s22_s7   ;;  %s4582_s30 = sphi %s4652_s30, %s6324_s30   ;;  %s4578_s29 = sphi %s4650_s29, %s6323_s29   ;;  %s4574_s28 = sphi %s4648_s28, %s6322_s28   ;;  %s4570_s27 = sphi %s4646_s27, %s6321_s27   ;;  %s4566_s26 = sphi %s4644_s26, %s6320_s26   ;;  %s4562_s25 = sphi %s4642_s25, %s6319_s25   ;;  %s4558_s24 = sphi %s4640_s24, %s6318_s24   ;;  %s4554_s23 = sphi %s4638_s23, %s6317_s23   ;;  %s4550_s22 = sphi %s4636_s22, %s6316_s22   ;;  %s4546_s21 = sphi %s4634_s21, %s6315_s21  }
  0x10   : > { %p32_p0 = scmp.ge.s32.totalorder %s31_s9, 4  ;;  %s34_s10 = sadd.s32 1, %s4582_s30 }
  0x11   : > { %p38_p1 = scmp.lt.s32.totalorder %s4578_s29, 1  ;;  %s47_s11 = sadd.s32 1, %s4566_s26 }
  0x12   : > { %s6326_s9 = smov (%p32_p0, %s31_s9), 0  ;;  %s6328_s10 = smov (!%p32_p0, %s34_s10), %s4582_s30 }
  0x13   : > { %6250 = sst [smem:[#allocation12_spill]] %s6326_s9  ;;  %p36_p2 = scmp.ge.s32.totalorder %s6328_s10, 2 }
  0x14   : > { %s39_s12 = scalar_select %p38_p1, %s4578_s29, 1 }
  0x15   : > { %p40_p3 = scmp.lt.s32.totalorder %s6326_s9, 1  ;;  %p54_p4 = scmp.ne.s32.totalorder %s4566_s26, %s4562_s25 }
  0x16   : > { %p6219_p5 = scmp.eq.s32.totalorder %s4586_s7, 0  ;;  %s6330_s10 = smov (%p36_p2, %s6328_s10), 0 }
  0x17   : > { %6251 = sst [smem:[#allocation13_spill]] %s6330_s10  ;;  %s4707_s14 = ssub.s32 %s4582_s30, %s6330_s10 }
  0x18   : > { %s41_s13 = scalar_select %p40_p3, %s6326_s9, 1 }
  0x19   : > { %p4711_p6 = por %p6219_p5, %p54_p4  ;;  %p60_p7 = scmp.ne.s32.totalorder %s4562_s25, %s4558_s24 }
  0x1a   : > { %s43_s16 = ssub.s32 %s39_s12, %s41_s13  ;;  %p4718_p8 = scmp.eq.s32.totalorder %s3679_s8, 0 }
  0x1b   : > { %s44_s17 = sor.u32 %s43_s16, %s4707_s14  ;;  %p6218_p11 = scmp.lt.s32.totalorder %s4586_s7, 8 }
  0x1c   : > { %p45_p9 = scmp.eq.s32.totalorder %s44_s17, 0  ;;  %p4724_p10 = por %p4718_p8, %p60_p7 }
  0x1d   : > { %s240_s24 = sand.u32 1, %s4566_s26   ;;  %s3686_s13 = sshll.u32 %s4582_s30, 1 }
  0x1e   : > { %s6254_s19 = scalar_select %p4724_p10, 1, 0 }
  0x1f   : > { %s4730_s20 = scalar_select %p45_p9, %s4566_s26, %s47_s11  }
  0x20   : > { %s3685_s10 = sshll.u32 %s240_s24, 3  ;;  %s251_s16 = sadd.s32 %s3686_s13, %s39_s12 }
  0x21   : > { %s3687_s8 = sshll.u32 %s251_s16, 7  ;;  %s244_s5 = scalar_lea.vmem [#allocation6], %s3685_s10 }
  0x22   : > { %s255_s4 = sshll.u32 %s244_s5, 4  ;;  %s6255_s0 = sld [smem:[#allocation33_spill]]  ;;  %s4741_s4 = int_to_ptr.vmem [resolvable:$true] %s255_s4 }
  0x23   : > { %p4747_p12 = pnand %p6218_p11, %p4711_p6  ;;  %s241_s5 = scalar_lea.sflag [#allocation7], %s240_s24 }
  0x25   : > { %p4434_p2 = pneg %p4747_p12 }
  0x28   : > { %s4739_s17 = scalar_lea.hbm %s6255_s0, %s3687_s8  ;;  %s4437_s12 = scalar_lea.hbm %s6255_s0, 512 }
  0x29   : > { %s4432_s2 = scalar_lea.hbm %s4739_s17, 128  ;;  %p4438_p6 = scmp.lt.u32.totalorder %s4739_s17, %s6255_s0 }
  0x2a   : > { %p4433_p1 = scmp.ne.s32.totalorder %s4739_s17, %s4432_s2  ;;  %p4439_p7 = scmp.lt.u32.totalorder %s4437_s12, %s4432_s2 }
  0x2b   : > { %p4441_p11 = scmp.lt.u32.totalorder %s4432_s2, %s4739_s17 }
  0x2c   : > { %p4435_p3 = pnand %p4434_p2, %p4433_p1  ;;  %p4440_p9 = por %p4439_p7, %p4438_p6 }
  0x2e   : > { %p4436_p4 = pneg %p4435_p3  ;;  %p4442_p5 = por %p4441_p11, %p4440_p9 }
  0x30   : > { %p4443_p13 = pnand %p4442_p5, %p4436_p4 }
  0x32   : > { %4446 = shalt.err (!%p4443_p13)
}
  0x33   : > { %s4447_s24 = scalar_lea.vmem %s4741_s4, 128  ;;  %s4588_s8 = smov [#allocation6]  }
  0x34   : > { %p4448_p1 = scmp.ne.s32.totalorder %s4741_s4, %s4447_s24  ;;  %s4452_s3 = sshll.u32 %s4588_s8, 4  ;;  %s4453_s3 = int_to_ptr.vmem [resolvable:$false] %s4452_s3 }
  0x35   : > { %s4454_s10 = scalar_lea.vmem %s4453_s3, 256  ;;  %p4455_p10 = scmp.lt.s32.totalorder %s4741_s4, %s4453_s3 }
  0x36   : > { %p4450_p3 = pnand %p4448_p1, %p4434_p2  ;;  %p4456_p6 = scmp.lt.s32.totalorder %s4454_s10, %s4447_s24 }
  0x38   : > { %p4451_p0 = pneg %p4450_p3  ;;  %p4457_p7 = por %p4456_p6, %p4455_p10 }
  0x3a   : > { %p4458_p11 = pnand %p4457_p7, %p4451_p0 }
  0x3c   : > { %4461 = shalt.err (!%p4458_p11)
}
  0x3d   : > { %4328 = dma.hbm_to_vmem [thread:$0]  (!%p4747_p12), %s4739_s17, 128, %s4741_s4, %s241_s5  }
  0x3e   : > { %p6257_p5 = scmp.lt.s32.totalorder %s4586_s7, 9  ;;  %p6258_p10 = scmp.ge.s32.totalorder %s4586_s7, 1 }
  0x3f   : > { %s3681_s2 = sadd.s32 4294967294, %s4578_s29  ;;  %s3682_s12 = sadd.s32 4294967294, %s6326_s9 }
  0x40   : > { %p4782_p13 = pnand %p6258_p10, %p6257_p5  ;;  %p71_p0 = scmp.gt.s32.totalorder %s3681_s2, 0 }
  0x41   : > { %p74_p2 = scmp.gt.s32.totalorder %s3682_s12, 0  ;;  %p88_p4 = scmp.ne.s32.totalorder %s4554_s23, %s4550_s22 }
  0x42   : > { %s6332_s2 = smov (!%p71_p0, %s3681_s2), 0  ;;  %p94_p9 = scmp.ne.s32.totalorder %s4550_s22, %s4546_s21 }
  0x43   : > { %s6334_s12 = smov (!%p74_p2, %s3682_s12), 0  ;;  %s262_s4 = sand.u32 1, %s4554_s23  }
  0x44   : > { %s77_s15 = ssub.s32 %s6332_s2, %s6334_s12  ;;  %s81_s5 = sadd.s32 1, %s4554_s23 }
  0x45   : > { %s78_s17 = sor.u32 %s77_s15, %s4707_s14  ;;  %p4797_p1 = por %p94_p9, %p4718_p8 }
  0x46   : > { %p79_p12 = scmp.eq.s32.totalorder %s78_s17, 0  ;;  %p6261_p3 = scmp.eq.s32.totalorder %s4586_s7, 0 }
  0x47   : > { %s6260_s16 = scalar_select %p4797_p1, 1, 0 }
  0x48   : > { %p90_p6 = por %p88_p4, %p6261_p3  ;;  %s3688_s24 = sshll.u32 %s262_s4, 3 }
  0x49   : > { %s4804_s8 = scalar_select %p79_p12, %s4554_s23, %s81_s5  }
  0x4a   : > { %s274_s3 = sadd.s32 %s3686_s13, %s6332_s2  ;;  %s266_s21 = scalar_lea.vmem [#allocation8], %s3688_s24 }
  0x4b   : > { %s3691_s10 = sshll.u32 %s274_s3, 7  ;;  %s278_s0 = sshll.u32 %s266_s21, 4  ;;  %s4813_s0 = int_to_ptr.vmem [resolvable:$true] %s278_s0 }
  0x4c   : > { %s4811_s14 = scalar_lea.hbm %s6207_s1, %s3691_s10  ;;  %p6262_p8 = scmp.lt.s32.totalorder %s4586_s7, 8 }
  0x4d   : > { %s263_s13 = scalar_lea.sflag [#allocation9], %s262_s4  ;;  %s4462_s2 = scalar_lea.hbm %s4811_s14, 128 }
  0x4e   : > { %p4817_p7 = pnand %p6262_p8, %p90_p6  ;;  %p4463_p11 = scmp.ne.s32.totalorder %s4811_s14, %s4462_s2 }
  0x4f   : > { %s4467_s17 = scalar_lea.hbm %s6207_s1, 512  ;;  %p4468_p2 = scmp.lt.u32.totalorder %s4811_s14, %s6207_s1 }
  0x50   : > { %p4464_p5 = pneg %p4817_p7  ;;  %p4469_p4 = scmp.lt.u32.totalorder %s4467_s17, %s4462_s2 }
  0x51   : > { %p4471_p12 = scmp.lt.u32.totalorder %s4462_s2, %s4811_s14 }
  0x52   : > { %p4465_p10 = pnand %p4464_p5, %p4463_p11  ;;  %p4470_p9 = por %p4469_p4, %p4468_p2 }
  0x54   : > { %p4466_p0 = pneg %p4465_p10  ;;  %p4472_p3 = por %p4471_p12, %p4470_p9 }
  0x56   : > { %p4473_p6 = pnand %p4472_p3, %p4466_p0 }
  0x58   : > { %4476 = shalt.err (!%p4473_p6)
}
  0x59   : > { %s4477_s4 = scalar_lea.vmem %s4813_s0, 128  ;;  %s4589_s3 = smov [#allocation8]  }
  0x5a   : > { %p4478_p8 = scmp.ne.s32.totalorder %s4813_s0, %s4477_s4  ;;  %s4482_s10 = sshll.u32 %s4589_s3, 4  ;;  %s4483_s10 = int_to_ptr.vmem [resolvable:$false] %s4482_s10 }
  0x5b   : > { %s4484_s21 = scalar_lea.vmem %s4483_s10, 256  ;;  %p4485_p1 = scmp.lt.s32.totalorder %s4813_s0, %s4483_s10 }
  0x5c   : > { %p4480_p11 = pnand %p4478_p8, %p4464_p5  ;;  %p4486_p2 = scmp.lt.s32.totalorder %s4484_s21, %s4477_s4 }
  0x5e   : > { %p4481_p10 = pneg %p4480_p11  ;;  %p4487_p4 = por %p4486_p2, %p4485_p1 }
  0x60   : > { %p4488_p9 = pnand %p4487_p4, %p4481_p10 }
  0x62   : > { %4491 = shalt.err (!%p4488_p9)
}
  0x63   : > { %4331 = dma.hbm_to_vmem [thread:$0]  (!%p4817_p7), %s4811_s14, 128, %s4813_s0, %s263_s13  }
  0x64   : > { %287 = sbr.rel (%p4782_p13) target bundleno = 1355 (0x54b), region = 44 }
  0x6b   : > { %s289_s12 = sand.u32 1, %s4562_s25   ;;  %p6264_p5 = scmp.ne.s32.totalorder %s6254_s19, 0 }
  0x6c   : > { %s4849_s2 = sshll.u32 %s289_s12, 3  ;;  %s290_s9 = scalar_lea.sflag [#allocation7], %s289_s12 }
  0x6d   : > { %s293_s15 = scalar_lea.vmem [#allocation6], %s4849_s2 }
  0x6e   : > { %4537 = dma.done.wait (%p6264_p5), %s290_s9, 128  }
  0x6f   : > { %4539 = vsyncadd (%p6264_p5), %s290_s9, 4294967168  ;;  %s298_s18 = sand.u32 1, %s4550_s22   ;;  %p6265_p13 = scmp.ne.s32.totalorder %s6260_s16, 0 }
  0x70   : > { %s4857_s0 = sshll.u32 %s298_s18, 3  ;;  %s299_s11 = scalar_lea.sflag [#allocation9], %s298_s18 }
  0x71   : > { %s302_s14 = scalar_lea.vmem [#allocation8], %s4857_s0 }
  0x72   : > { %4541 = dma.done.wait (%p6265_p13), %s299_s11, 128  }
  0x73   : > { %4543 = vsyncadd (%p6265_p13), %s299_s11, 4294967168  ;;  %p340_p1 = scmp.lt.s32.totalorder %s4574_s28, 1  ;;  %p3696_p7 = scmp.ne.s32.totalorder %s4570_s27, 0 }
  0x74   : > { %v4590_v0 = vmov (!%p3696_p7), 0.0   ;;  %v4591_v1 = vmov (!%p3696_p7), -inf   ;;  %v4592_v2 = vmov (!%p3696_p7), inf  }
  0x75   : > { %s6336_s28 = smov (!%p340_p1, %s4574_s28), 1  ;;  %348 = sbr.rel (%p3696_p7) target bundleno = 124 (0x7c), region = 56 }
  0x76   : > { %s3695_s13 = sshll.u32 %s6336_s28, 3  ;;  %349 = vst [vmem:[#allocation2] sm:$0xff] (!%p3696_p7), %v4590_v0  ;;  %350 = vst [vmem:[#allocation3] sm:$0xff] (!%p3696_p7), %v4590_v0 }
  0x77   : > { %s4869_s5 = scalar_lea.vmem %s6212_s6, %s3695_s13  ;;  %351 = vst [vmem:[#allocation4] sm:$0xff] (!%p3696_p7), %v4591_v1  ;;  %352 = vst [vmem:[#allocation5] sm:$0xff] (!%p3696_p7), %v4592_v2 }
  0x7c PF: > { %s6266_s4 = sld [smem:[#allocation34_spill]]  ;;  %p3697_p0 = scmp.ge.s32.totalorder %s4570_s27, 2 }
  0x7d   : > { %v374_v27 = vld [vmem:[%s293_s15] sm:$0xff] (!%p3697_p0)  ;;  %v4593_v30 = vmov (!%p3697_p0), 0   ;;  %vm497_vm0 = vcmask (!%p3697_p0), 261120   ;;  %v377_v38 = vlaneseq (!%p3697_p0)  ;;  %v4594_v41 = vmov (!%p3697_p0), 1966171168   ;;  %s6270_s12 = sld [smem:[#allocation35_spill]] (!%p3697_p0) }
  0x7e   : > { %533 = vmatprep.mubr.bf16.mxu0 (!%p3697_p0), %v4593_v30  ;;  %574 = vmatprep.mubr.bf16.mxu1 (!%p3697_p0), %v4593_v30  ;;  %v375_v31 = vpack.c.bf16 (!%p3697_p0), %v374_v27, %v374_v27  ;;  %v879_v42 = vunpack.c.l.s4 (!%p3697_p0), %v4594_v41 }
  0x7f   : > { %v4991_v39 = vshrl.u32 (!%p3697_p0), %v377_v38, 7 }
  0x80   : > { %v880_v48 = vunpack.c.0.s8 (!%p3697_p0), %v879_v42 }
  0x81   : > { %v379_v40 = vsub.s32 (!%p3697_p0), 0, %v4991_v39  ;;  %v387_v43 = vsub.s32 (!%p3697_p0), 2, %v4991_v39  ;;  %v383_v45 = vsub.s32 (!%p3697_p0), 1, %v4991_v39  ;;  %v391_v46 = vsub.s32 (!%p3697_p0), 3, %v4991_v39 }
  0x82   : > { %v4875_v3 = vld [vmem:[%s6266_s4] sm:$0xff]  ;;  %v4880_v4 = vld [vmem:[%s6266_s4 + $0x8] sm:$0xff]  ;;  %v4885_v5 = vld [vmem:[%s6266_s4 + $0x10] sm:$0xff]  ;;  %372 = sbr.rel (%p3697_p0) target bundleno = 425 (0x1a9), region = 60  ;;  %v395_v50 = vsub.s32 (!%p3697_p0), 4, %v4991_v39  ;;  %v403_v53 = vsub.s32 (!%p3697_p0), 6, %v4991_v39  ;;  %v5010_v58 = vsub.s32 (!%p3697_p0), %v880_v48, %v4991_v39 }
  0x83   : > { %v4890_v6 = vld [vmem:[%s6266_s4 + $0x18] sm:$0xff]  ;;  %v4895_v7 = vld [vmem:[%s6266_s4 + $0x20] sm:$0xff]  ;;  %v4900_v8 = vld [vmem:[%s6266_s4 + $0x28] sm:$0xff]  ;;  %v399_v54 = vsub.s32 (!%p3697_p0), 5, %v4991_v39 }
  0x84   : > { %v4905_v9 = vld [vmem:[%s6266_s4 + $0x30] sm:$0xff]  ;;  %v4910_v10 = vld [vmem:[%s6266_s4 + $0x38] sm:$0xff]  ;;  %v4915_v11 = vld [vmem:[%s6266_s4 + $0x40] sm:$0xff]  ;;  %v3699_v19 = vcombine.high (!%p3697_p0), %v4875_v3, %v4895_v7  ;;  %v3701_v20 = vcombine.high (!%p3697_p0), %v4880_v4, %v4900_v8  ;;  %v3698_v21 = vcombine.low (!%p3697_p0), %v4875_v3, %v4895_v7  ;;  %v3700_v22 = vcombine.low (!%p3697_p0), %v4880_v4, %v4900_v8 }
  0x85   : > { %v4920_v12 = vld [vmem:[%s6266_s4 + $0x48] sm:$0xff]  ;;  %v4925_v13 = vld [vmem:[%s6266_s4 + $0x50] sm:$0xff]  ;;  %v4930_v14 = vld [vmem:[%s6266_s4 + $0x58] sm:$0xff]  ;;  %v3703_v28 = vcombine.high (!%p3697_p0), %v4885_v5, %v4905_v9  ;;  %v3705_v29 = vcombine.high (!%p3697_p0), %v4890_v6, %v4910_v10  ;;  %v3702_v32 = vcombine.low (!%p3697_p0), %v4885_v5, %v4905_v9  ;;  %v3704_v33 = vcombine.low (!%p3697_p0), %v4890_v6, %v4910_v10 }
  0x86   : > { %6267 = vst [vmem:[#allocation14_spill] sm:$0xff] %v4925_v13  ;;  %6268 = vst [vmem:[#allocation15_spill] sm:$0xff] %v4930_v14  ;;  %v4935_v15 = vld [vmem:[%s6266_s4 + $0x60] sm:$0xff]  ;;  %v4940_v16 = vld [vmem:[%s6266_s4 + $0x68] sm:$0xff]  ;;  %501 = vmatprep.subr.bf16.mxu0 (!%p3697_p0), %v3699_v19  ;;  %542 = vmatprep.subr.bf16.mxu1 (!%p3697_p0), %v3701_v20 }
  0x87   : > { %v4945_v17 = vld [vmem:[%s6266_s4 + $0x70] sm:$0xff]  ;;  %v4950_v18 = vld [vmem:[%s6266_s4 + $0x78] sm:$0xff]  ;;  %v3707_v23 = vcombine.high (!%p3697_p0), %v4915_v11, %v4935_v15  ;;  %v3709_v24 = vcombine.high (!%p3697_p0), %v4920_v12, %v4940_v16  ;;  %502 = vmatpush1.bf16.msra.mxu0 (!%p3697_p0), %v3698_v21  ;;  %543 = vmatpush1.bf16.msra.mxu1 (!%p3697_p0), %v3700_v22  ;;  %v3706_v25 = vcombine.low (!%p3697_p0), %v4915_v11, %v4935_v15 }
  0x88   : > { %6269 = vst [vmem:[#allocation16_spill] sm:$0xff] %v4950_v18  ;;  %v3708_v26 = vcombine.low (!%p3697_p0), %v4920_v12, %v4940_v16  ;;  %v3711_v34 = vcombine.high (!%p3697_p0), %v4925_v13, %v4945_v17  ;;  %v3713_v35 = vcombine.high (!%p3697_p0), %v4930_v14, %v4950_v18  ;;  %v3710_v36 = vcombine.low (!%p3697_p0), %v4925_v13, %v4945_v17  ;;  %v4998_v44 = vld [vmem:[%s6270_s12] ss:$4 sm:$0xff] (!%p3697_p0) }
  0x89   : > { %503 = vmatprep.subr.bf16.mxu0 %v3707_v23  ;;  %544 = vmatprep.subr.bf16.mxu1 %v3709_v24  ;;  %v3712_v37 = vcombine.low %v4930_v14, %v4950_v18  ;;  %v380_v47 = vrot.slane %v4998_v44, %v379_v40  ;;  %v388_v49 = vrot.slane %v4998_v44, %v387_v43 }
  0x8a   : > { %v384_v51 = vrot.slane %v4998_v44, %v383_v45  ;;  %v392_v52 = vrot.slane %v4998_v44, %v391_v46  ;;  %v5013_v62 = vrot.slane %v4998_v44, %v395_v50  ;;  %v5020_v19 = vrot.slane %v4998_v44, %v403_v53 }
  0x8b   : > { %504 = vmatpush1.bf16.msra.mxu0 %v3706_v25  ;;  %545 = vmatpush1.bf16.msra.mxu1 %v3708_v26  ;;  %v5023_v20 = vrot.slane %v4998_v44, %v399_v54 }
  0x8c   : > { %583 = vmatprep.subr.bf16.mxu0 %v3703_v28  ;;  %624 = vmatprep.subr.bf16.mxu1 %v3705_v29 }
  0x8e   : > { %3714 = vmatmul.mubr.msk.bf16.vlgmr.msra.gmra.mrb[0].mxu0 %vm497_vm0, %v375_v31  ;;  %3715 = vmatmul.mubr.msk.bf16.vlgmr.msra.gmra.mrb[0].mxu1 %vm497_vm0, %v375_v31 }
  0x8f   : > { %584 = vmatpush1.bf16.msra.mxu0 %v3702_v32  ;;  %625 = vmatpush1.bf16.msra.mxu1 %v3704_v33 }
  0x90   : > { %585 = vmatprep.subr.bf16.mxu0 %v3711_v34  ;;  %626 = vmatprep.subr.bf16.mxu1 %v3713_v35 }
  0x91   : > { %615 = vmatprep.mubr.bf16.mxu0 %v4593_v30  ;;  %656 = vmatprep.mubr.bf16.mxu1 %v4593_v30 }
  0x93   : > { %586 = vmatpush1.bf16.msra.mxu0 %v3710_v36  ;;  %627 = vmatpush1.bf16.msra.mxu1 %v3712_v37 }
  0x96   : > { %3716 = vmatmul.mubr.msk.bf16.vlgmr.msra.gmra.mrb[4].mxu0 %vm497_vm0, %v375_v31  ;;  %3717 = vmatmul.mubr.msk.bf16.vlgmr.msra.gmra.mrb[4].mxu1 %vm497_vm0, %v375_v31 }
 0x161   : > { %v535_v55 = vpop.f32.mrb[0].mxu0  ;;  %v576_v56 = vpop.f32.mrb[0].mxu1 }
 0x162   : > { %v536_v57 = vadd.f32 %v535_v55, %v380_v47  ;;  %v577_v59 = vadd.f32 %v576_v56, %v388_v49  ;;  %v537_v60 = vpop.f32.mrb[1].mxu0  ;;  %v578_v61 = vpop.f32.mrb[1].mxu1 }
 0x163   : > { %v5015_v63 = vadd.f32 %v537_v60, %v384_v51  ;;  %v5017_v0 = vadd.f32 %v578_v61, %v392_v52  ;;  %v539_v1 = vpop.f32.mrb[2].mxu0  ;;  %v580_v2 = vpop.f32.mrb[2].mxu1 }
 0x164   : > { %v665_v21 = vrot.slane %v536_v57, 4  ;;  %v713_v22 = vmul.f32 %v536_v57, %v536_v57  ;;  %v677_v23 = vrot.slane %v577_v59, 4  ;;  %v715_v24 = vmul.f32 %v577_v59, %v577_v59  ;;  %v540_v25 = vpop.f32.mrb[3].mxu0  ;;  %v581_v26 = vpop.f32.mrb[3].mxu1 }
 0x165   : > { %v671_v27 = vrot.slane %v5015_v63, 4  ;;  %v714_v28 = vmul.f32 %v5015_v63, %v5015_v63  ;;  %v5029_v29 = vrot.slane %v5017_v0, 4  ;;  %v5033_v30 = vmul.f32 %v5017_v0, %v5017_v0 }
 0x166   : > { %v666_v31 = vadd.f32 %v665_v21, %v536_v57  ;;  %v721_v32 = vrot.slane %v713_v22, 4  ;;  %v770_v33 = vmax.f32 %v536_v57, %v665_v21  ;;  %v818_v34 = vmin.f32 %v536_v57, %v665_v21 }
 0x167   : > { %v678_v35 = vadd.f32 %v677_v23, %v577_v59  ;;  %v733_v36 = vrot.slane %v715_v24, 4  ;;  %v782_v37 = vmax.f32 %v577_v59, %v677_v23  ;;  %v830_v38 = vmin.f32 %v577_v59, %v677_v23 }
 0x168   : > { %v667_v40 = vrot.slane %v666_v31, 2  ;;  %v722_v41 = vadd.f32 %v721_v32, %v713_v22  ;;  %v771_v42 = vrot.slane %v770_v33, 2  ;;  %v819_v43 = vrot.slane %v818_v34, 2 }
 0x169   : > { %v679_v45 = vrot.slane %v678_v35, 2  ;;  %v734_v46 = vadd.f32 %v733_v36, %v715_v24  ;;  %v783_v47 = vrot.slane %v782_v37, 2  ;;  %v831_v48 = vrot.slane %v830_v38, 2  ;;  %v5035_v49 = vpop.f32.mrb[4].mxu0  ;;  %v5037_v50 = vpop.f32.mrb[4].mxu1 }
 0x16a   : > { %v668_v51 = vadd.f32 %v667_v40, %v666_v31  ;;  %v723_v52 = vrot.slane %v722_v41, 2  ;;  %v772_v53 = vmax.f32 %v770_v33, %v771_v42  ;;  %v820_v54 = vmin.f32 %v818_v34, %v819_v43  ;;  %v5039_v55 = vpop.f32.mrb[5].mxu0  ;;  %v5041_v56 = vpop.f32.mrb[5].mxu1 }
 0x16b   : > { %v680_v57 = vadd.f32 %v679_v45, %v678_v35  ;;  %v735_v59 = vrot.slane %v734_v46, 2  ;;  %v784_v60 = vmax.f32 %v782_v37, %v783_v47  ;;  %v832_v61 = vmin.f32 %v830_v38, %v831_v48  ;;  %v621_v1 = vpop.f32.mrb[6].mxu0  ;;  %v662_v2 = vpop.f32.mrb[6].mxu1 }
 0x16c   : > { %v669_v21 = vrot.slane %v668_v51, 1  ;;  %v724_v22 = vadd.f32 %v723_v52, %v722_v41  ;;  %v773_v23 = vrot.slane %v772_v53, 1  ;;  %v821_v24 = vrot.slane %v820_v54, 1  ;;  %v622_v25 = vpop.f32.mrb[7].mxu0  ;;  %v663_v26 = vpop.f32.mrb[7].mxu1 }
 0x16d   : > { %v681_v31 = vrot.slane %v680_v57, 1  ;;  %v736_v32 = vadd.f32 %v735_v59, %v734_v46  ;;  %v785_v33 = vrot.slane %v784_v60, 1  ;;  %v833_v34 = vrot.slane %v832_v61, 1 }
 0x16e   : > { %v670_v36 = vadd.f32 %v669_v21, %v668_v51  ;;  %v725_v40 = vrot.slane %v724_v22, 1  ;;  %v774_v42 = vmax.f32 %v772_v53, %v773_v23  ;;  %v822_v43 = vmin.f32 %v820_v54, %v821_v24 }
 0x16f   : > { %v682_v35 = vadd.f32 %v681_v31, %v680_v57  ;;  %v737_v45 = vrot.slane %v736_v32, 1  ;;  %v786_v37 = vmax.f32 %v784_v60, %v785_v33  ;;  %v5043_v38 = vmin.f32 %v832_v61, %v833_v34 }
 0x170   : > { %v726_v47 = vadd.f32 %v725_v40, %v724_v22  ;;  %v672_v41 = vadd.f32 %v671_v27, %v5015_v63  ;;  %v727_v48 = vrot.slane %v714_v28, 4  ;;  %v776_v52 = vmax.f32 %v5015_v63, %v671_v27 }
 0x171   : > { %v738_v1 = vadd.f32 %v737_v45, %v736_v32  ;;  %v824_v46 = vmin.f32 %v5015_v63, %v671_v27  ;;  %v684_v51 = vadd.f32 %v5029_v29, %v5017_v0  ;;  %v739_v53 = vrot.slane %v5033_v30, 4 }
 0x172   : > { %v673_v54 = vrot.slane %v672_v41, 2  ;;  %v728_v57 = vadd.f32 %v727_v48, %v714_v28  ;;  %v777_v59 = vrot.slane %v776_v52, 2  ;;  %v788_v60 = vmax.f32 %v5017_v0, %v5029_v29 }
 0x173   : > { %v825_v61 = vrot.slane %v824_v46, 2  ;;  %v685_v2 = vrot.slane %v684_v51, 2  ;;  %v740_v21 = vadd.f32 %v739_v53, %v5033_v30  ;;  %v836_v22 = vmin.f32 %v5017_v0, %v5029_v29 }
 0x174   : > { %v674_v23 = vadd.f32 %v673_v54, %v672_v41  ;;  %v729_v63 = vrot.slane %v728_v57, 2  ;;  %v778_v27 = vmax.f32 %v776_v52, %v777_v59  ;;  %v789_v24 = vrot.slane %v788_v60, 2 }
 0x175   : > { %v826_v25 = vmin.f32 %v824_v46, %v825_v61  ;;  %v686_v26 = vadd.f32 %v685_v2, %v684_v51  ;;  %v741_v31 = vrot.slane %v740_v21, 2  ;;  %v837_v32 = vrot.slane %v836_v22, 2 }
 0x176   : > { %v675_v28 = vrot.slane %v674_v23, 1  ;;  %v730_v33 = vadd.f32 %v729_v63, %v728_v57  ;;  %v779_v34 = vrot.slane %v778_v27, 1  ;;  %v790_v40 = vmax.f32 %v788_v60, %v789_v24 }
 0x177   : > { %v827_v45 = vrot.slane %v826_v25, 1  ;;  %v687_v48 = vrot.slane %v686_v26, 1  ;;  %v742_v14 = vadd.f32 %v741_v31, %v740_v21  ;;  %v838_v18 = vmin.f32 %v836_v22, %v837_v32 }
 0x178   : > { %v676_v30 = vadd.f32 %v675_v28, %v674_v23  ;;  %v731_v53 = vrot.slane %v730_v33, 1  ;;  %v780_v13 = vmax.f32 %v778_v27, %v779_v34  ;;  %v791_v0 = vrot.slane %v790_v40, 1 }
 0x179   : > { %v828_v29 = vmin.f32 %v826_v25, %v827_v45  ;;  %v688_v41 = vadd.f32 %v687_v48, %v686_v26  ;;  %v743_v52 = vrot.slane %v742_v14, 1  ;;  %v839_v54 = vrot.slane %v838_v18, 1 }
 0x17a   : > { %v732_v46 = vadd.f32 %v731_v53, %v730_v33  ;;  %v874_v51 = vcombine.low %v670_v36, %v676_v30  ;;  %v996_v59 = vcombine.low %v774_v42, %v780_v13  ;;  %v792_v61 = vmax.f32 %v790_v40, %v791_v0 }
 0x17b   : > { %v1057_v2 = vcombine.low %v822_v43, %v828_v29  ;;  %v744_v57 = vadd.f32 %v743_v52, %v742_v14  ;;  %v840_v63 = vmin.f32 %v838_v18, %v839_v54  ;;  %v875_v60 = vcombine.low %v682_v35, %v688_v41 }
 0x17c   : > { %v5057_v24 = vrot.slane %v874_v51, %v5010_v58  ;;  %v935_v21 = vcombine.low %v726_v47, %v732_v46  ;;  %v5060_v22 = vrot.slane %v996_v59, %v5010_v58  ;;  %v997_v23 = vcombine.low %v786_v37, %v792_v61 }
 0x17d   : > { %v5063_v27 = vrot.slane %v1057_v2, %v5010_v58  ;;  %v5066_v25 = vrot.slane %v875_v60, %v5010_v58  ;;  %v936_v13 = vcombine.low %v738_v1, %v744_v57  ;;  %v1058_v36 = vcombine.low %v5043_v38, %v840_v63 }
 0x17e   : > { %v5070_v14 = vrot.slane %v935_v21, %v5010_v58  ;;  %v5073_v18 = vrot.slane %v997_v23, %v5010_v58  ;;  %v618_v42 = vadd.f32 %v5035_v49, %v5013_v62  ;;  %v659_v43 = vadd.f32 %v5037_v50, %v5020_v19 }
 0x17f   : > { %v906_v35 = vcombine.low %v5057_v24, %v5066_v25  ;;  %v5082_v37 = vrot.slane %v936_v13, %v5010_v58  ;;  %v5085_v38 = vrot.slane %v1058_v36, %v5010_v58  ;;  %v407_v47 = vsub.s32 7, %v4991_v39 }
 0x180   : > { %v689_v26 = vrot.slane %v618_v42, 4  ;;  %v717_v31 = vmul.f32 %v618_v42, %v618_v42  ;;  %v701_v62 = vrot.slane %v659_v43, 4  ;;  %v719_v50 = vmul.f32 %v659_v43, %v659_v43 }
 0x181   : > { %v620_v39 = vadd.f32 %v5039_v55, %v5023_v20  ;;  %v408_v45 = vrot.slane %v4998_v44, %v407_v47  ;;  %v6273_v25 = vcombine.low %v5070_v14, %v5082_v37 }
 0x182   : > { %v690_v32 = vadd.f32 %v689_v26, %v618_v42  ;;  %v745_v28 = vrot.slane %v717_v31, 4  ;;  %v794_v33 = vmax.f32 %v618_v42, %v689_v26  ;;  %v842_v34 = vmin.f32 %v618_v42, %v689_v26 }
 0x183   : > { %v702_v40 = vadd.f32 %v701_v62, %v659_v43  ;;  %v757_v0 = vrot.slane %v719_v50, 4  ;;  %v806_v52 = vmax.f32 %v659_v43, %v701_v62  ;;  %v854_v54 = vmin.f32 %v659_v43, %v701_v62 }
 0x184   : > { %v691_v48 = vrot.slane %v690_v32, 2  ;;  %v746_v30 = vadd.f32 %v745_v28, %v717_v31  ;;  %v795_v53 = vrot.slane %v794_v33, 2  ;;  %v843_v29 = vrot.slane %v842_v34, 2 }
 0x185   : > { %v703_v41 = vrot.slane %v702_v40, 2  ;;  %v758_v61 = vadd.f32 %v757_v0, %v719_v50  ;;  %v807_v63 = vrot.slane %v806_v52, 2  ;;  %v855_v60 = vrot.slane %v854_v54, 2 }
 0x186   : > { %v692_v46 = vadd.f32 %v691_v48, %v690_v32  ;;  %v747_v51 = vrot.slane %v746_v30, 2  ;;  %v796_v59 = vmax.f32 %v794_v33, %v795_v53  ;;  %v844_v2 = vmin.f32 %v842_v34, %v843_v29 }
 0x187   : > { %v704_v57 = vadd.f32 %v703_v41, %v702_v40  ;;  %v759_v44 = vrot.slane %v758_v61, 2  ;;  %v808_v36 = vmax.f32 %v806_v52, %v807_v63  ;;  %v856_v42 = vmin.f32 %v854_v54, %v855_v60 }
 0x188   : > { %v693_v21 = vrot.slane %v692_v46, 1  ;;  %v748_v20 = vadd.f32 %v747_v51, %v746_v30  ;;  %v797_v55 = vrot.slane %v796_v59, 1  ;;  %v845_v23 = vrot.slane %v844_v2, 1 }
 0x189   : > { %v705_v13 = vrot.slane %v704_v57, 1  ;;  %v760_v26 = vadd.f32 %v759_v44, %v758_v61  ;;  %v809_v43 = vrot.slane %v808_v36, 1  ;;  %v857_v62 = vrot.slane %v856_v42, 1 }
 0x18a   : > { %v749_v47 = vrot.slane %v748_v20, 1  ;;  %v694_v31 = vadd.f32 %v693_v21, %v692_v46  ;;  %v798_v32 = vmax.f32 %v796_v59, %v797_v55  ;;  %v695_v50 = vrot.slane %v620_v39, 4 }
 0x18b   : > { %v761_v28 = vrot.slane %v760_v26, 1  ;;  %v718_v33 = vmul.f32 %v620_v39, %v620_v39  ;;  %v846_v40 = vmin.f32 %v844_v2, %v845_v23  ;;  %v706_v48 = vadd.f32 %v705_v13, %v704_v57 }
 0x18c   : > { %v750_v34 = vadd.f32 %v749_v47, %v748_v20  ;;  %v661_v30 = vadd.f32 %v5041_v56, %v408_v45  ;;  %v810_v53 = vmax.f32 %v808_v36, %v809_v43  ;;  %v696_v0 = vadd.f32 %v695_v50, %v620_v39 }
 0x18d   : > { %v751_v29 = vrot.slane %v718_v33, 4  ;;  %v800_v41 = vmax.f32 %v620_v39, %v695_v50  ;;  %v858_v52 = vmin.f32 %v856_v42, %v857_v62  ;;  %v848_v54 = vmin.f32 %v620_v39, %v695_v50 }
 0x18e   : > { %v707_v51 = vrot.slane %v661_v30, 4  ;;  %v720_v61 = vmul.f32 %v661_v30, %v661_v30  ;;  %v762_v46 = vadd.f32 %v761_v28, %v760_v26  ;;  %v697_v63 = vrot.slane %v696_v0, 2 }
 0x18f   : > { %v752_v60 = vadd.f32 %v751_v29, %v718_v33  ;;  %v801_v59 = vrot.slane %v800_v41, 2  ;;  %v849_v21 = vrot.slane %v848_v54, 2 }
 0x190   : > { %v708_v55 = vadd.f32 %v707_v51, %v661_v30  ;;  %v763_v44 = vrot.slane %v720_v61, 4  ;;  %v812_v20 = vmax.f32 %v661_v30, %v707_v51  ;;  %v698_v2 = vadd.f32 %v697_v63, %v696_v0 }
 0x191   : > { %v753_v57 = vrot.slane %v752_v60, 2  ;;  %v802_v23 = vmax.f32 %v800_v41, %v801_v59  ;;  %v860_v56 = vmin.f32 %v661_v30, %v707_v51  ;;  %v850_v45 = vmin.f32 %v848_v54, %v849_v21 }
 0x192   : > { %v709_v13 = vrot.slane %v708_v55, 2  ;;  %v764_v36 = vadd.f32 %v763_v44, %v720_v61  ;;  %v813_v47 = vrot.slane %v812_v20, 2  ;;  %v699_v42 = vrot.slane %v698_v2, 1 }
 0x193   : > { %v754_v39 = vadd.f32 %v753_v57, %v752_v60  ;;  %v803_v43 = vrot.slane %v802_v23, 1  ;;  %v861_v62 = vrot.slane %v860_v56, 2  ;;  %v851_v26 = vrot.slane %v850_v45, 1 }
 0x194   : > { %v710_v28 = vadd.f32 %v709_v13, %v708_v55  ;;  %v765_v50 = vrot.slane %v764_v36, 2  ;;  %v814_v33 = vmax.f32 %v812_v20, %v813_v47  ;;  %v700_v29 = vadd.f32 %v699_v42, %v698_v2 }
 0x195   : > { %v755_v19 = vrot.slane %v754_v39, 1  ;;  %v804_v49 = vmax.f32 %v802_v23, %v803_v43  ;;  %v862_v1 = vmin.f32 %v860_v56, %v861_v62  ;;  %v852_v0 = vmin.f32 %v850_v45, %v851_v26 }
 0x196   : > { %v711_v63 = vrot.slane %v710_v28, 1  ;;  %v766_v41 = vadd.f32 %v765_v50, %v764_v36  ;;  %v815_v30 = vrot.slane %v814_v33, 1  ;;  %v876_v51 = vcombine.low %v694_v31, %v700_v29  ;;  %v865_v50 = vld [vmem:[#allocation2] sm:$0xff] }
 0x197   : > { %v756_v54 = vadd.f32 %v755_v19, %v754_v39  ;;  %v998_v61 = vcombine.low %v798_v32, %v804_v49  ;;  %v863_v59 = vrot.slane %v862_v1, 1  ;;  %v1059_v21 = vcombine.low %v846_v40, %v852_v0  ;;  %v1048_v0 = vld [vmem:[#allocation5] sm:$0xff] }
 0x198   : > { %v712_v60 = vadd.f32 %v711_v63, %v710_v28  ;;  %v767_v44 = vrot.slane %v766_v41, 1  ;;  %v816_v57 = vmax.f32 %v814_v33, %v815_v30  ;;  %v898_v55 = vrot.slane %v876_v51, %v5010_v58  ;;  %v987_v33 = vld [vmem:[#allocation4] sm:$0xff]  ;;  %v926_v63 = vld [vmem:[#allocation3] sm:$0xff] }
 0x199   : > { %v937_v13 = vcombine.low %v750_v34, %v756_v54  ;;  %v864_v20 = vmin.f32 %v862_v1, %v863_v59  ;;  %v1020_v2 = vrot.slane %v998_v61, %v5010_v58  ;;  %v1081_v36 = vrot.slane %v1059_v21, %v5010_v58 }
 0x19a   : > { %v768_v23 = vadd.f32 %v767_v44, %v766_v41  ;;  %v877_v56 = vcombine.low %v706_v48, %v712_v60  ;;  %v999_v45 = vcombine.low %v810_v53, %v816_v57  ;;  %v914_v48 = vrot.slane %v906_v35, %v5010_v58 }
 0x19b   : > { %v1060_v47 = vcombine.low %v858_v52, %v864_v20  ;;  %v959_v19 = vrot.slane %v937_v13, %v5010_v58  ;;  %v6271_v52 = vcombine.low %v5060_v22, %v5073_v18  ;;  %v6272_v26 = vcombine.low %v5063_v27, %v5085_v38 }
 0x19c   : > { %v905_v49 = vrot.slane %v877_v56, %v5010_v58  ;;  %v938_v31 = vcombine.low %v762_v46, %v768_v23  ;;  %v1027_v32 = vrot.slane %v999_v45, %v5010_v58  ;;  %v975_v22 = vrot.slane %v6273_v25, %v5010_v58 }
 0x19d   : > { %v1088_v40 = vrot.slane %v1060_v47, %v5010_v58  ;;  %v1036_v39 = vrot.slane %v6271_v52, %v5010_v58  ;;  %v1097_v28 = vrot.slane %v6272_v26, %v5010_v58 }
 0x19e   : > { %v907_v42 = vcombine.low %v898_v55, %v905_v49  ;;  %v966_v1 = vrot.slane %v938_v31, %v5010_v58  ;;  %v1029_v34 = vcombine.low %v1020_v2, %v1027_v32 }
 0x19f   : > { %v1090_v53 = vcombine.low %v1081_v36, %v1088_v40 }
 0x1a0   : > { %v921_v46 = vrot.slane %v907_v42, %v5010_v58  ;;  %v968_v43 = vcombine.low %v959_v19, %v966_v1  ;;  %v1043_v62 = vrot.slane %v1029_v34, %v5010_v58 }
 0x1a1   : > { %v1104_v24 = vrot.slane %v1090_v53, %v5010_v58 }
 0x1a2   : > { %v922_v18 = vcombine.low %v914_v48, %v921_v46  ;;  %v982_v35 = vrot.slane %v968_v43, %v5010_v58  ;;  %v1044_v29 = vcombine.low %v1036_v39, %v1043_v62 }
 0x1a3   : > { %v1105_v41 = vcombine.low %v1097_v28, %v1104_v24 }
 0x1a4   : > { %v924_v30 = vadd.f32 %v922_v18, %v865_v50  ;;  %v983_v54 = vcombine.low %v975_v22, %v982_v35  ;;  %v1046_v27 = vmax.f32 %v987_v33, %v1044_v29 }
 0x1a5   : > { %v1107_v38 = vmin.f32 %v1048_v0, %v1105_v41 }
 0x1a6   : > { %925 = vst [vmem:[#allocation2] sm:$0xff] %v924_v30  ;;  %v985_v51 = vadd.f32 %v983_v54, %v926_v63  ;;  %1047 = vst [vmem:[#allocation4] sm:$0xff] %v1046_v27 }
 0x1a7   : > { %1108 = vst [vmem:[#allocation5] sm:$0xff] %v1107_v38 }
 0x1a8   : > { %986 = vst [vmem:[#allocation3] sm:$0xff] %v985_v51 }
 0x1a9 PF: > { %p3718_p12 = scmp.lt.s32.totalorder %s4570_s27, 2 }
 0x1aa   : > { %v3721_v58 = vcombine.high (!%p3718_p12), %v4875_v3, %v4895_v7  ;;  %v3723_v14 = vcombine.high (!%p3718_p12), %v4880_v4, %v4900_v8  ;;  %v3720_v37 = vcombine.low (!%p3718_p12), %v4875_v3, %v4895_v7  ;;  %v3722_v61 = vcombine.low (!%p3718_p12), %v4880_v4, %v4900_v8  ;;  %v1115_v3 = vld [vmem:[%s302_s14] sm:$0xff] (!%p3718_p12)  ;;  %s6277_s9 = sld [smem:[#allocation35_spill]] (!%p3718_p12) }
 0x1ab   : > { %1112 = sbr.rel (%p3718_p12) target bundleno = 719 (0x2cf), region = 64  ;;  %v3729_v59 = vcombine.high (!%p3718_p12), %v4915_v11, %v4935_v15  ;;  %v3731_v21 = vcombine.high (!%p3718_p12), %v4920_v12, %v4940_v16  ;;  %v3728_v60 = vcombine.low (!%p3718_p12), %v4915_v11, %v4935_v15  ;;  %v3730_v44 = vcombine.low (!%p3718_p12), %v4920_v12, %v4940_v16 }
 0x1ac   : > { %1242 = vmatprep.subr.bf16.mxu0 (!%p3718_p12), %v3721_v58  ;;  %1283 = vmatprep.subr.bf16.mxu1 (!%p3718_p12), %v3723_v14  ;;  %v3725_v4 = vcombine.high (!%p3718_p12), %v4885_v5, %v4905_v9  ;;  %v3727_v7 = vcombine.high (!%p3718_p12), %v4890_v6, %v4910_v10  ;;  %v4595_v8 = vmov (!%p3718_p12), 0   ;;  %v1116_v57 = vpack.c.bf16 (!%p3718_p12), %v1115_v3, %v1115_v3 }
 0x1ad   : > { %1243 = vmatpush1.bf16.msra.mxu0 (!%p3718_p12), %v3720_v37  ;;  %1284 = vmatpush1.bf16.msra.mxu1 (!%p3718_p12), %v3722_v61  ;;  %vm1238_vm1 = vcmask (!%p3718_p12), 261120   ;;  %v3724_v11 = vcombine.low (!%p3718_p12), %v4885_v5, %v4905_v9  ;;  %v3726_v12 = vcombine.low (!%p3718_p12), %v4890_v6, %v4910_v10  ;;  %v6274_v15 = vld [vmem:[#allocation14_spill] sm:$0xff] (!%p3718_p12)  ;;  %v6276_v13 = vld [vmem:[#allocation15_spill] sm:$0xff] (!%p3718_p12)  ;;  %v1118_v9 = vlaneseq (!%p3718_p12) }
 0x1ae   : > { %1244 = vmatprep.subr.bf16.mxu0 (!%p3718_p12), %v3729_v59  ;;  %1285 = vmatprep.subr.bf16.mxu1 (!%p3718_p12), %v3731_v21  ;;  %v3733_v16 = vcombine.high (!%p3718_p12), %v6274_v15, %v4945_v17  ;;  %v3732_v5 = vcombine.low (!%p3718_p12), %v6274_v15, %v4945_v17  ;;  %v4596_v23 = vmov (!%p3718_p12), 1966171168  }
 0x1af   : > { %1274 = vmatprep.mubr.bf16.mxu0 (!%p3718_p12), %v4595_v8  ;;  %1315 = vmatprep.mubr.bf16.mxu1 (!%p3718_p12), %v4595_v8  ;;  %v6275_v55 = vld [vmem:[#allocation16_spill] sm:$0xff] (!%p3718_p12)  ;;  %v5165_v10 = vshrl.u32 (!%p3718_p12), %v1118_v9, 7  ;;  %v1620_v17 = vunpack.c.l.s4 (!%p3718_p12), %v4596_v23 }
 0x1b0   : > { %v3735_v20 = vcombine.high (!%p3718_p12), %v6276_v13, %v6275_v55  ;;  %v3734_v6 = vcombine.low (!%p3718_p12), %v6276_v13, %v6275_v55  ;;  %v5172_v45 = vld [vmem:[%s6277_s9 + $0x1] ss:$4 sm:$0xff] (!%p3718_p12) }
 0x1b1   : > { %1245 = vmatpush1.bf16.msra.mxu0 (!%p3718_p12), %v3728_v60  ;;  %1286 = vmatpush1.bf16.msra.mxu1 (!%p3718_p12), %v3730_v44  ;;  %v1120_v2 = vsub.s32 (!%p3718_p12), 0, %v5165_v10  ;;  %v1128_v56 = vsub.s32 (!%p3718_p12), 2, %v5165_v10  ;;  %v1124_v36 = vsub.s32 (!%p3718_p12), 1, %v5165_v10  ;;  %v1132_v47 = vsub.s32 (!%p3718_p12), 3, %v5165_v10 }
 0x1b2   : > { %1324 = vmatprep.subr.bf16.mxu0 %v3725_v4  ;;  %1365 = vmatprep.subr.bf16.mxu1 %v3727_v7  ;;  %v1621_v49 = vunpack.c.0.s8 %v1620_v17  ;;  %v1136_v32 = vsub.s32 4, %v5165_v10  ;;  %v1144_v1 = vsub.s32 6, %v5165_v10  ;;  %v1140_v34 = vsub.s32 5, %v5165_v10 }
 0x1b3   : > { %v1121_v19 = vrot.slane %v5172_v45, %v1120_v2  ;;  %v1129_v31 = vrot.slane %v5172_v45, %v1128_v56  ;;  %v1125_v40 = vrot.slane %v5172_v45, %v1124_v36  ;;  %v1133_v42 = vrot.slane %v5172_v45, %v1132_v47 }
 0x1b4   : > { %3736 = vmatmul.mubr.msk.bf16.vlgmr.msra.gmra.mrb[0].mxu0 %vm1238_vm1, %v1116_v57  ;;  %3737 = vmatmul.mubr.msk.bf16.vlgmr.msra.gmra.mrb[0].mxu1 %vm1238_vm1, %v1116_v57  ;;  %v5184_v39 = vsub.s32 %v1621_v49, %v5165_v10  ;;  %v5187_v26 = vrot.slane %v5172_v45, %v1136_v32  ;;  %v5194_v25 = vrot.slane %v5172_v45, %v1144_v1 }
 0x1b5   : > { %1325 = vmatpush1.bf16.msra.mxu0 %v3724_v11  ;;  %1366 = vmatpush1.bf16.msra.mxu1 %v3726_v12  ;;  %v5197_v22 = vrot.slane %v5172_v45, %v1140_v34 }
 0x1b6   : > { %1326 = vmatprep.subr.bf16.mxu0 %v3733_v16  ;;  %1367 = vmatprep.subr.bf16.mxu1 %v3735_v20 }
 0x1b7   : > { %1356 = vmatprep.mubr.bf16.mxu0 %v4595_v8  ;;  %1397 = vmatprep.mubr.bf16.mxu1 %v4595_v8 }
 0x1b9   : > { %1327 = vmatpush1.bf16.msra.mxu0 %v3732_v5  ;;  %1368 = vmatpush1.bf16.msra.mxu1 %v3734_v6 }
 0x1bc   : > { %3738 = vmatmul.mubr.msk.bf16.vlgmr.msra.gmra.mrb[4].mxu0 %vm1238_vm1, %v1116_v57  ;;  %3739 = vmatmul.mubr.msk.bf16.vlgmr.msra.gmra.mrb[4].mxu1 %vm1238_vm1, %v1116_v57 }
 0x287   : > { %v1276_v48 = vpop.f32.mrb[0].mxu0  ;;  %v1317_v53 = vpop.f32.mrb[0].mxu1 }
 0x288   : > { %v1277_v52 = vadd.f32 %v1276_v48, %v1121_v19  ;;  %v1318_v46 = vadd.f32 %v1317_v53, %v1129_v31  ;;  %v1278_v43 = vpop.f32.mrb[1].mxu0  ;;  %v1319_v62 = vpop.f32.mrb[1].mxu1 }
 0x289   : > { %v5189_v28 = vadd.f32 %v1278_v43, %v1125_v40  ;;  %v5191_v50 = vadd.f32 %v1319_v62, %v1133_v42  ;;  %v1280_v33 = vpop.f32.mrb[2].mxu0  ;;  %v1321_v24 = vpop.f32.mrb[2].mxu1 }
 0x28a   : > { %v1406_v18 = vrot.slane %v1277_v52, 4  ;;  %v1454_v35 = vmul.f32 %v1277_v52, %v1277_v52  ;;  %v1418_v29 = vrot.slane %v1318_v46, 4  ;;  %v1456_v0 = vmul.f32 %v1318_v46, %v1318_v46  ;;  %v1281_v63 = vpop.f32.mrb[3].mxu0  ;;  %v1322_v41 = vpop.f32.mrb[3].mxu1 }
 0x28b   : > { %v1412_v30 = vrot.slane %v5189_v28, 4  ;;  %v1455_v54 = vmul.f32 %v5189_v28, %v5189_v28  ;;  %v5203_v27 = vrot.slane %v5191_v50, 4  ;;  %v5207_v38 = vmul.f32 %v5191_v50, %v5191_v50 }
 0x28c   : > { %v1407_v51 = vadd.f32 %v1406_v18, %v1277_v52  ;;  %v1462_v58 = vrot.slane %v1454_v35, 4  ;;  %v1511_v14 = vmax.f32 %v1277_v52, %v1406_v18  ;;  %v1559_v37 = vmin.f32 %v1277_v52, %v1406_v18 }
 0x28d   : > { %v1419_v61 = vadd.f32 %v1418_v29, %v1318_v46  ;;  %v1474_v59 = vrot.slane %v1456_v0, 4  ;;  %v1523_v21 = vmax.f32 %v1318_v46, %v1418_v29  ;;  %v1571_v60 = vmin.f32 %v1318_v46, %v1418_v29 }
 0x28e   : > { %v1408_v44 = vrot.slane %v1407_v51, 2  ;;  %v1463_v3 = vadd.f32 %v1462_v58, %v1454_v35  ;;  %v1512_v4 = vrot.slane %v1511_v14, 2  ;;  %v1560_v7 = vrot.slane %v1559_v37, 2 }
 0x28f   : > { %v1420_v8 = vrot.slane %v1419_v61, 2  ;;  %v1475_v57 = vadd.f32 %v1474_v59, %v1456_v0  ;;  %v1524_v11 = vrot.slane %v1523_v21, 2  ;;  %v1572_v12 = vrot.slane %v1571_v60, 2  ;;  %v5209_v15 = vpop.f32.mrb[4].mxu0  ;;  %v5211_v16 = vpop.f32.mrb[4].mxu1 }
 0x290   : > { %v1409_v55 = vadd.f32 %v1408_v44, %v1407_v51  ;;  %v1464_v13 = vrot.slane %v1463_v3, 2  ;;  %v1513_v20 = vmax.f32 %v1511_v14, %v1512_v4  ;;  %v1561_v5 = vmin.f32 %v1559_v37, %v1560_v7  ;;  %v5213_v6 = vpop.f32.mrb[5].mxu0  ;;  %v5215_v9 = vpop.f32.mrb[5].mxu1 }
 0x291   : > { %v1421_v2 = vadd.f32 %v1420_v8, %v1419_v61  ;;  %v1476_v23 = vrot.slane %v1475_v57, 2  ;;  %v1525_v17 = vmax.f32 %v1523_v21, %v1524_v11  ;;  %v1573_v56 = vmin.f32 %v1571_v60, %v1572_v12  ;;  %v1362_v36 = vpop.f32.mrb[6].mxu0  ;;  %v1403_v47 = vpop.f32.mrb[6].mxu1 }
 0x292   : > { %v1410_v19 = vrot.slane %v1409_v55, 1  ;;  %v1465_v49 = vadd.f32 %v1464_v13, %v1463_v3  ;;  %v1514_v31 = vrot.slane %v1513_v20, 1  ;;  %v1562_v32 = vrot.slane %v1561_v5, 1  ;;  %v1363_v40 = vpop.f32.mrb[7].mxu0  ;;  %v1404_v42 = vpop.f32.mrb[7].mxu1 }
 0x293   : > { %v1422_v1 = vrot.slane %v1421_v2, 1  ;;  %v1477_v34 = vadd.f32 %v1476_v23, %v1475_v57  ;;  %v1526_v48 = vrot.slane %v1525_v17, 1  ;;  %v1574_v53 = vrot.slane %v1573_v56, 1 }
 0x294   : > { %v1411_v52 = vadd.f32 %v1410_v19, %v1409_v55  ;;  %v1466_v46 = vrot.slane %v1465_v49, 1  ;;  %v1515_v43 = vmax.f32 %v1513_v20, %v1514_v31  ;;  %v1563_v62 = vmin.f32 %v1561_v5, %v1562_v32 }
 0x295   : > { %v1423_v33 = vadd.f32 %v1422_v1, %v1421_v2  ;;  %v1478_v24 = vrot.slane %v1477_v34, 1  ;;  %v1527_v18 = vmax.f32 %v1525_v17, %v1526_v48  ;;  %v5217_v35 = vmin.f32 %v1573_v56, %v1574_v53 }
 0x296   : > { %v1467_v29 = vadd.f32 %v1466_v46, %v1465_v49  ;;  %v1413_v0 = vadd.f32 %v1412_v30, %v5189_v28  ;;  %v1468_v63 = vrot.slane %v1455_v54, 4  ;;  %v1517_v41 = vmax.f32 %v5189_v28, %v1412_v30 }
 0x297   : > { %v1479_v51 = vadd.f32 %v1478_v24, %v1477_v34  ;;  %v1565_v58 = vmin.f32 %v5189_v28, %v1412_v30  ;;  %v1425_v14 = vadd.f32 %v5203_v27, %v5191_v50  ;;  %v1480_v37 = vrot.slane %v5207_v38, 4 }
 0x298   : > { %v1414_v61 = vrot.slane %v1413_v0, 2  ;;  %v1469_v59 = vadd.f32 %v1468_v63, %v1455_v54  ;;  %v1518_v21 = vrot.slane %v1517_v41, 2  ;;  %v1529_v60 = vmax.f32 %v5191_v50, %v5203_v27 }
 0x299   : > { %v1566_v44 = vrot.slane %v1565_v58, 2  ;;  %v1426_v3 = vrot.slane %v1425_v14, 2  ;;  %v1481_v4 = vadd.f32 %v1480_v37, %v5207_v38  ;;  %v1577_v7 = vmin.f32 %v5191_v50, %v5203_v27 }
 0x29a   : > { %v1415_v8 = vadd.f32 %v1414_v61, %v1413_v0  ;;  %v1470_v28 = vrot.slane %v1469_v59, 2  ;;  %v1519_v30 = vmax.f32 %v1517_v41, %v1518_v21  ;;  %v1530_v57 = vrot.slane %v1529_v60, 2 }
 0x29b   : > { %v1567_v11 = vmin.f32 %v1565_v58, %v1566_v44  ;;  %v1427_v12 = vadd.f32 %v1426_v3, %v1425_v14  ;;  %v1482_v55 = vrot.slane %v1481_v4, 2  ;;  %v1578_v13 = vrot.slane %v1577_v7, 2 }
 0x29c   : > { %v1416_v54 = vrot.slane %v1415_v8, 1  ;;  %v1471_v20 = vadd.f32 %v1470_v28, %v1469_v59  ;;  %v1520_v5 = vrot.slane %v1519_v30, 1  ;;  %v1531_v2 = vmax.f32 %v1529_v60, %v1530_v57 }
 0x29d   : > { %v1568_v23 = vrot.slane %v1567_v11, 1  ;;  %v1428_v17 = vrot.slane %v1427_v12, 1  ;;  %v1483_v56 = vadd.f32 %v1482_v55, %v1481_v4  ;;  %v1579_v36 = vmin.f32 %v1577_v7, %v1578_v13 }
 0x29e   : > { %v1417_v38 = vadd.f32 %v1416_v54, %v1415_v8  ;;  %v1472_v47 = vrot.slane %v1471_v20, 1  ;;  %v1521_v19 = vmax.f32 %v1519_v30, %v1520_v5  ;;  %v1532_v50 = vrot.slane %v1531_v2, 1 }
 0x29f   : > { %v1569_v27 = vmin.f32 %v1567_v11, %v1568_v23  ;;  %v1429_v49 = vadd.f32 %v1428_v17, %v1427_v12  ;;  %v1484_v31 = vrot.slane %v1483_v56, 1  ;;  %v1580_v32 = vrot.slane %v1579_v36, 1 }
 0x2a0   : > { %v1473_v40 = vadd.f32 %v1472_v47, %v1471_v20  ;;  %v1615_v42 = vcombine.low %v1411_v52, %v1417_v38  ;;  %v1737_v1 = vcombine.low %v1515_v43, %v1521_v19  ;;  %v1533_v34 = vmax.f32 %v1531_v2, %v1532_v50 }
 0x2a1   : > { %v1798_v48 = vcombine.low %v1563_v62, %v1569_v27  ;;  %v1485_v53 = vadd.f32 %v1484_v31, %v1483_v56  ;;  %v1581_v46 = vmin.f32 %v1579_v36, %v1580_v32  ;;  %v1616_v24 = vcombine.low %v1423_v33, %v1429_v49 }
 0x2a2   : > { %v5231_v0 = vrot.slane %v1615_v42, %v5184_v39  ;;  %v1676_v63 = vcombine.low %v1467_v29, %v1473_v40  ;;  %v5234_v41 = vrot.slane %v1737_v1, %v5184_v39  ;;  %v1738_v58 = vcombine.low %v1527_v18, %v1533_v34 }
 0x2a3   : > { %v5237_v14 = vrot.slane %v1798_v48, %v5184_v39  ;;  %v5240_v37 = vrot.slane %v1616_v24, %v5184_v39  ;;  %v1677_v52 = vcombine.low %v1479_v51, %v1485_v53  ;;  %v1799_v43 = vcombine.low %v5217_v35, %v1581_v46 }
 0x2a4   : > { %v5244_v62 = vrot.slane %v1676_v63, %v5184_v39  ;;  %v5247_v33 = vrot.slane %v1738_v58, %v5184_v39  ;;  %v1359_v29 = vadd.f32 %v5209_v15, %v5187_v26  ;;  %v1400_v18 = vadd.f32 %v5211_v16, %v5194_v25 }
 0x2a5   : > { %v1647_v61 = vcombine.low %v5231_v0, %v5240_v37  ;;  %v5256_v59 = vrot.slane %v1677_v52, %v5184_v39  ;;  %v5259_v35 = vrot.slane %v1799_v43, %v5184_v39  ;;  %v1148_v51 = vsub.s32 7, %v5165_v10 }
 0x2a6   : > { %v1769_v21 = vcombine.low %v5234_v41, %v5247_v33  ;;  %v1430_v60 = vrot.slane %v1359_v29, 4  ;;  %v1458_v44 = vmul.f32 %v1359_v29, %v1359_v29  ;;  %v1442_v26 = vrot.slane %v1400_v18, 4 }
 0x2a7   : > { %v1708_v25 = vcombine.low %v5244_v62, %v5256_v59  ;;  %v1830_v15 = vcombine.low %v5237_v14, %v5259_v35  ;;  %v1460_v16 = vmul.f32 %v1400_v18, %v1400_v18  ;;  %v1361_v10 = vadd.f32 %v5213_v6, %v5197_v22 }
 0x2a8   : > { %v1431_v3 = vadd.f32 %v1430_v60, %v1359_v29  ;;  %v1486_v4 = vrot.slane %v1458_v44, 4  ;;  %v1535_v7 = vmax.f32 %v1359_v29, %v1430_v60  ;;  %v1583_v8 = vmin.f32 %v1359_v29, %v1430_v60 }
 0x2a9   : > { %v1443_v28 = vadd.f32 %v1442_v26, %v1400_v18  ;;  %v1149_v30 = vrot.slane %v5172_v45, %v1148_v51  ;;  %v1498_v55 = vrot.slane %v1460_v16, 4  ;;  %v1547_v20 = vmax.f32 %v1400_v18, %v1442_v26 }
 0x2aa   : > { %v1432_v57 = vrot.slane %v1431_v3, 2  ;;  %v1487_v11 = vadd.f32 %v1486_v4, %v1458_v44  ;;  %v1536_v12 = vrot.slane %v1535_v7, 2  ;;  %v1584_v13 = vrot.slane %v1583_v8, 2 }
 0x2ab   : > { %v1444_v54 = vrot.slane %v1443_v28, 2  ;;  %v1595_v5 = vmin.f32 %v1400_v18, %v1442_v26  ;;  %v1499_v56 = vadd.f32 %v1498_v55, %v1460_v16  ;;  %v1548_v47 = vrot.slane %v1547_v20, 2 }
 0x2ac   : > { %v1433_v2 = vadd.f32 %v1432_v57, %v1431_v3  ;;  %v1488_v23 = vrot.slane %v1487_v11, 2  ;;  %v1537_v17 = vmax.f32 %v1535_v7, %v1536_v12  ;;  %v1585_v36 = vmin.f32 %v1583_v8, %v1584_v13 }
 0x2ad   : > { %v1445_v38 = vadd.f32 %v1444_v54, %v1443_v28  ;;  %v1596_v19 = vrot.slane %v1595_v5, 2  ;;  %v1500_v45 = vrot.slane %v1499_v56, 2  ;;  %v1549_v31 = vmax.f32 %v1547_v20, %v1548_v47 }
 0x2ae   : > { %v1434_v50 = vrot.slane %v1433_v2, 1  ;;  %v1489_v22 = vadd.f32 %v1488_v23, %v1487_v11  ;;  %v1538_v6 = vrot.slane %v1537_v17, 1  ;;  %v1586_v27 = vrot.slane %v1585_v36, 1 }
 0x2af   : > { %v1446_v49 = vrot.slane %v1445_v38, 1  ;;  %v1597_v32 = vmin.f32 %v1595_v5, %v1596_v19  ;;  %v1501_v42 = vadd.f32 %v1500_v45, %v1499_v56  ;;  %v1550_v34 = vrot.slane %v1549_v31, 1 }
 0x2b0   : > { %v1490_v40 = vrot.slane %v1489_v22, 1  ;;  %v1435_v1 = vadd.f32 %v1434_v50, %v1433_v2  ;;  %v1539_v53 = vmax.f32 %v1537_v17, %v1538_v6  ;;  %v1436_v24 = vrot.slane %v1361_v10, 4 }
 0x2b1   : > { %v1598_v48 = vrot.slane %v1597_v32, 1  ;;  %v1502_v46 = vrot.slane %v1501_v42, 1  ;;  %v1459_v63 = vmul.f32 %v1361_v10, %v1361_v10  ;;  %v1587_v52 = vmin.f32 %v1585_v36, %v1586_v27 }
 0x2b2   : > { %v1491_v58 = vadd.f32 %v1490_v40, %v1489_v22  ;;  %v1447_v43 = vadd.f32 %v1446_v49, %v1445_v38  ;;  %v1402_v29 = vadd.f32 %v5215_v9, %v1149_v30  ;;  %v1551_v18 = vmax.f32 %v1549_v31, %v1550_v34 }
 0x2b3   : > { %v1437_v51 = vadd.f32 %v1436_v24, %v1361_v10  ;;  %v1492_v60 = vrot.slane %v1459_v63, 4  ;;  %v1541_v44 = vmax.f32 %v1361_v10, %v1436_v24  ;;  %v1599_v26 = vmin.f32 %v1597_v32, %v1598_v48 }
 0x2b4   : > { %v1589_v16 = vmin.f32 %v1361_v10, %v1436_v24  ;;  %v1448_v3 = vrot.slane %v1402_v29, 4  ;;  %v1461_v4 = vmul.f32 %v1402_v29, %v1402_v29  ;;  %v1503_v7 = vadd.f32 %v1502_v46, %v1501_v42 }
 0x2b5   : > { %v1438_v8 = vrot.slane %v1437_v51, 2  ;;  %v1493_v28 = vadd.f32 %v1492_v60, %v1459_v63  ;;  %v1542_v57 = vrot.slane %v1541_v44, 2  ;;  %v1716_v41 = vrot.slane %v1708_v25, %v5184_v39 }
 0x2b6   : > { %v1590_v11 = vrot.slane %v1589_v16, 2  ;;  %v1449_v12 = vadd.f32 %v1448_v3, %v1402_v29  ;;  %v1504_v55 = vrot.slane %v1461_v4, 4  ;;  %v1553_v13 = vmax.f32 %v1402_v29, %v1448_v3 }
 0x2b7   : > { %v1439_v54 = vadd.f32 %v1438_v8, %v1437_v51  ;;  %v1494_v20 = vrot.slane %v1493_v28, 2  ;;  %v1543_v5 = vmax.f32 %v1541_v44, %v1542_v57  ;;  %v1601_v9 = vmin.f32 %v1402_v29, %v1448_v3 }
 0x2b8   : > { %v1591_v30 = vmin.f32 %v1589_v16, %v1590_v11  ;;  %v1450_v2 = vrot.slane %v1449_v12, 2  ;;  %v1505_v23 = vadd.f32 %v1504_v55, %v1461_v4  ;;  %v1554_v17 = vrot.slane %v1553_v13, 2 }
 0x2b9   : > { %v1440_v56 = vrot.slane %v1439_v54, 1  ;;  %v1495_v10 = vadd.f32 %v1494_v20, %v1493_v28  ;;  %v1544_v36 = vrot.slane %v1543_v5, 1  ;;  %v1602_v38 = vrot.slane %v1601_v9, 2 }
 0x2ba   : > { %v1592_v47 = vrot.slane %v1591_v30, 1  ;;  %v1451_v19 = vadd.f32 %v1450_v2, %v1449_v12  ;;  %v1506_v50 = vrot.slane %v1505_v23, 2  ;;  %v1555_v22 = vmax.f32 %v1553_v13, %v1554_v17  ;;  %v1606_v2 = vld [vmem:[#allocation2] sm:$0xff]  ;;  %v1667_v17 = vld [vmem:[#allocation3] sm:$0xff] }
 0x2bb   : > { %v1441_v6 = vadd.f32 %v1440_v56, %v1439_v54  ;;  %v1496_v45 = vrot.slane %v1495_v10, 1  ;;  %v1545_v27 = vmax.f32 %v1543_v5, %v1544_v36  ;;  %v1603_v49 = vmin.f32 %v1601_v9, %v1602_v38 }
 0x2bc   : > { %v1593_v31 = vmin.f32 %v1591_v30, %v1592_v47  ;;  %v1452_v32 = vrot.slane %v1451_v19, 1  ;;  %v1507_v40 = vadd.f32 %v1506_v50, %v1505_v23  ;;  %v1556_v42 = vrot.slane %v1555_v22, 1  ;;  %v1728_v23 = vld [vmem:[#allocation4] sm:$0xff] }
 0x2bd   : > { %v1497_v34 = vadd.f32 %v1496_v45, %v1495_v10  ;;  %v1617_v48 = vcombine.low %v1435_v1, %v1441_v6  ;;  %v1739_v46 = vcombine.low %v1539_v53, %v1545_v27  ;;  %v1604_v24 = vrot.slane %v1603_v49, 1 }
 0x2be   : > { %v1800_v63 = vcombine.low %v1587_v52, %v1593_v31  ;;  %v1453_v29 = vadd.f32 %v1452_v32, %v1451_v19  ;;  %v1508_v51 = vrot.slane %v1507_v40, 1  ;;  %v1557_v60 = vmax.f32 %v1555_v22, %v1556_v42 }
 0x2bf   : > { %v1639_v44 = vrot.slane %v1617_v48, %v5184_v39  ;;  %v1678_v16 = vcombine.low %v1491_v58, %v1497_v34  ;;  %v1605_v3 = vmin.f32 %v1603_v49, %v1604_v24  ;;  %v1761_v4 = vrot.slane %v1739_v46, %v5184_v39 }
 0x2c0   : > { %v1509_v8 = vadd.f32 %v1508_v51, %v1507_v40  ;;  %v1618_v28 = vcombine.low %v1447_v43, %v1453_v29  ;;  %v1740_v57 = vcombine.low %v1551_v18, %v1557_v60  ;;  %v1822_v11 = vrot.slane %v1800_v63, %v5184_v39 }
 0x2c1   : > { %v1801_v12 = vcombine.low %v1599_v26, %v1605_v3  ;;  %v1700_v1 = vrot.slane %v1678_v16, %v5184_v39  ;;  %v1655_v43 = vrot.slane %v1647_v61, %v5184_v39  ;;  %v1777_v26 = vrot.slane %v1769_v21, %v5184_v39  ;;  %v1789_v21 = vld [vmem:[#allocation5] sm:$0xff] }
 0x2c2   : > { %v1646_v53 = vrot.slane %v1618_v28, %v5184_v39  ;;  %v1679_v52 = vcombine.low %v1503_v7, %v1509_v8  ;;  %v1768_v55 = vrot.slane %v1740_v57, %v5184_v39  ;;  %v1838_v30 = vrot.slane %v1830_v15, %v5184_v39 }
 0x2c3   : > { %v1829_v13 = vrot.slane %v1801_v12, %v5184_v39 }
 0x2c4   : > { %v1648_v54 = vcombine.low %v1639_v44, %v1646_v53  ;;  %v1707_v58 = vrot.slane %v1679_v52, %v5184_v39  ;;  %v1770_v20 = vcombine.low %v1761_v4, %v1768_v55 }
 0x2c5   : > { %v1831_v18 = vcombine.low %v1822_v11, %v1829_v13 }
 0x2c6   : > { %v1662_v7 = vrot.slane %v1648_v54, %v5184_v39  ;;  %v1709_v5 = vcombine.low %v1700_v1, %v1707_v58  ;;  %v1784_v9 = vrot.slane %v1770_v20, %v5184_v39 }
 0x2c7   : > { %v1845_v0 = vrot.slane %v1831_v18, %v5184_v39 }
 0x2c8   : > { %v1663_v37 = vcombine.low %v1655_v43, %v1662_v7  ;;  %v1723_v33 = vrot.slane %v1709_v5, %v5184_v39  ;;  %v1785_v61 = vcombine.low %v1777_v26, %v1784_v9 }
 0x2c9   : > { %v1846_v56 = vcombine.low %v1838_v30, %v1845_v0 }
 0x2ca   : > { %v1665_v10 = vadd.f32 %v1663_v37, %v1606_v2  ;;  %v1724_v36 = vcombine.low %v1716_v41, %v1723_v33  ;;  %v1787_v14 = vmax.f32 %v1728_v23, %v1785_v61 }
 0x2cb   : > { %v1848_v35 = vmin.f32 %v1789_v21, %v1846_v56 }
 0x2cc   : > { %1666 = vst [vmem:[#allocation2] sm:$0xff] %v1665_v10  ;;  %v1726_v15 = vadd.f32 %v1724_v36, %v1667_v17  ;;  %1788 = vst [vmem:[#allocation4] sm:$0xff] %v1787_v14 }
 0x2cd   : > { %1849 = vst [vmem:[#allocation5] sm:$0xff] %v1848_v35 }
 0x2ce   : > { %1727 = vst [vmem:[#allocation3] sm:$0xff] %v1726_v15 }
 0x2cf PF: > { %p3740_p3 = scmp.ne.s32.totalorder %s4570_s27, 3 }
 0x2d1   : > { %1853 = sbr.rel (%p3740_p3) target bundleno = 1355 (0x54b), region = 68 }
 0x2d8   : > { %s6278_s13 = sld [smem:[#allocation36_spill]]  ;;  %v1985_v9 = vlaneseq  ;;  %s6311_s17 = sld [smem:[#allocation37_spill]]  ;;  %vm2649_vm2 = vcmask 130048  }
 0x2d9   : > { %s6312_s16 = sld [smem:[#allocation35_spill]] }
 0x2da   : > { %v5477_v14 = vshrl.u32 %v1985_v9, 7 }
 0x2de   : > { %v1872_v39 = vld [vmem:[%s6278_s13 + $0x80] sm:$0xff]  ;;  %v1873_v62 = vld [vmem:[%s6278_s13 + $0x88] sm:$0xff]  ;;  %v1874_v27 = vld [vmem:[%s6278_s13 + $0x90] sm:$0xff] }
 0x2df   : > { %v1904_v59 = vld [vmem:[%s6278_s13 + $0x180] sm:$0xff]  ;;  %v5310_v25 = vpack.c.bf16 %v1873_v62, %v1872_v39  ;;  %v1905_v38 = vld [vmem:[%s6278_s13 + $0x188] sm:$0xff]  ;;  %v1875_v31 = vld [vmem:[%s6278_s13 + $0x98] sm:$0xff] }
 0x2e0   : > { %v1856_v47 = vld [vmem:[%s6278_s13] sm:$0xff]  ;;  %v1857_v19 = vld [vmem:[%s6278_s13 + $0x8] sm:$0xff]  ;;  %v5321_v50 = vpack.c.bf16 %v1905_v38, %v1904_v59  ;;  %v1906_v32 = vld [vmem:[%s6278_s13 + $0x190] sm:$0xff]  ;;  %v5348_v42 = vpack.c.bf16 %v1875_v31, %v1874_v27 }
 0x2e1   : > { %v5323_v22 = vpack.c.bf16 %v1857_v19, %v1856_v47  ;;  %v1888_v6 = vld [vmem:[%s6278_s13 + $0x100] sm:$0xff]  ;;  %v1889_v45 = vld [vmem:[%s6278_s13 + $0x108] sm:$0xff]  ;;  %4034 = vmatprep.subr.bf16.mxu0 %v5310_v25  ;;  %v1907_v40 = vld [vmem:[%s6278_s13 + $0x198] sm:$0xff] }
 0x2e2   : > { %v5335_v49 = vpack.c.bf16 %v1889_v45, %v1888_v6  ;;  %4066 = vmatprep.subr.bf16.mxu1 %v5321_v50  ;;  %v5350_v34 = vpack.c.bf16 %v1907_v40, %v1906_v32  ;;  %v1858_v48 = vld [vmem:[%s6278_s13 + $0x10] sm:$0xff]  ;;  %v1859_v46 = vld [vmem:[%s6278_s13 + $0x18] sm:$0xff]  ;;  %v1876_v51 = vld [vmem:[%s6278_s13 + $0xa0] sm:$0xff]  ;;  %v5516_v32 = vsub.s32 1, %v5477_v14  ;;  %v5519_v40 = vsub.s32 3, %v5477_v14 }
 0x2e3   : > { %4036 = vmatpush3.bf16.msra.mxu0 %v5323_v22  ;;  %v1890_v24 = vld [vmem:[%s6278_s13 + $0x110] sm:$0xff]  ;;  %v5362_v63 = vpack.c.bf16 %v1859_v46, %v1858_v48  ;;  %v1891_v29 = vld [vmem:[%s6278_s13 + $0x118] sm:$0xff]  ;;  %v1877_v60 = vld [vmem:[%s6278_s13 + $0xa8] sm:$0xff] }
 0x2e4   : > { %4068 = vmatpush3.bf16.msra.mxu1 %v5335_v49  ;;  %4038 = vmatprep.subr.bf16.mxu0 %v5348_v42  ;;  %v5375_v44 = vpack.c.bf16 %v1891_v29, %v1890_v24  ;;  %v5377_v16 = vpack.c.bf16 %v1877_v60, %v1876_v51  ;;  %v1908_v3 = vld [vmem:[%s6278_s13 + $0x1a0] sm:$0xff]  ;;  %v1909_v4 = vld [vmem:[%s6278_s13 + $0x1a8] sm:$0xff]  ;;  %v1878_v53 = vld [vmem:[%s6278_s13 + $0xb0] sm:$0xff] }
 0x2e5   : > { %4070 = vmatprep.subr.bf16.mxu1 %v5350_v34  ;;  %v1860_v8 = vld [vmem:[%s6278_s13 + $0x20] sm:$0xff]  ;;  %v5388_v28 = vpack.c.bf16 %v1909_v4, %v1908_v3  ;;  %v1861_v57 = vld [vmem:[%s6278_s13 + $0x28] sm:$0xff]  ;;  %v1879_v52 = vld [vmem:[%s6278_s13 + $0xb8] sm:$0xff] }
 0x2e6   : > { %v1892_v11 = vld [vmem:[%s6278_s13 + $0x120] sm:$0xff]  ;;  %v1893_v12 = vld [vmem:[%s6278_s13 + $0x128] sm:$0xff]  ;;  %v5400_v1 = vpack.c.bf16 %v1861_v57, %v1860_v8  ;;  %v1910_v55 = vld [vmem:[%s6278_s13 + $0x1b0] sm:$0xff]  ;;  %v5415_v54 = vpack.c.bf16 %v1879_v52, %v1878_v53 }
 0x2e7   : > { %4040 = vmatpush3.bf16.msra.mxu0 %v5362_v63  ;;  %v5413_v13 = vpack.c.bf16 %v1893_v12, %v1892_v11  ;;  %v1911_v58 = vld [vmem:[%s6278_s13 + $0x1b8] sm:$0xff]  ;;  %v1862_v20 = vld [vmem:[%s6278_s13 + $0x30] sm:$0xff]  ;;  %v1880_v5 = vld [vmem:[%s6278_s13 + $0xc0] sm:$0xff] }
 0x2e8   : > { %4072 = vmatpush3.bf16.msra.mxu1 %v5375_v44  ;;  %4042 = vmatprep.subr.bf16.mxu0 %v5377_v16  ;;  %v1863_v43 = vld [vmem:[%s6278_s13 + $0x38] sm:$0xff]  ;;  %v5427_v18 = vpack.c.bf16 %v1911_v58, %v1910_v55  ;;  %v1894_v26 = vld [vmem:[%s6278_s13 + $0x130] sm:$0xff]  ;;  %v1881_v30 = vld [vmem:[%s6278_s13 + $0xc8] sm:$0xff] }
 0x2e9   : > { %4074 = vmatprep.subr.bf16.mxu1 %v5388_v28  ;;  %v1895_v7 = vld [vmem:[%s6278_s13 + $0x138] sm:$0xff]  ;;  %v1912_v2 = vld [vmem:[%s6278_s13 + $0x1c0] sm:$0xff]  ;;  %v1913_v23 = vld [vmem:[%s6278_s13 + $0x1c8] sm:$0xff]  ;;  %v5448_v0 = vpack.c.bf16 %v1863_v43, %v1862_v20  ;;  %v5454_v37 = vpack.c.bf16 %v1881_v30, %v1880_v5 }
 0x2ea   : > { %v5452_v41 = vpack.c.bf16 %v1895_v7, %v1894_v26  ;;  %v1864_v33 = vld [vmem:[%s6278_s13 + $0x40] sm:$0xff]  ;;  %v1865_v61 = vld [vmem:[%s6278_s13 + $0x48] sm:$0xff]  ;;  %v5466_v17 = vpack.c.bf16 %v1913_v23, %v1912_v2  ;;  %v1882_v10 = vld [vmem:[%s6278_s13 + $0xd0] sm:$0xff] }
 0x2eb   : > { %4044 = vmatpush3.bf16.msra.mxu0 %v5400_v1  ;;  %v1896_v21 = vld [vmem:[%s6278_s13 + $0x140] sm:$0xff]  ;;  %v1897_v56 = vld [vmem:[%s6278_s13 + $0x148] sm:$0xff]  ;;  %v1883_v36 = vld [vmem:[%s6278_s13 + $0xd8] sm:$0xff]  ;;  %v5486_v39 = vpack.c.bf16 %v1865_v61, %v1864_v33 }
 0x2ec   : > { %4076 = vmatpush3.bf16.msra.mxu1 %v5413_v13  ;;  %4046 = vmatprep.subr.bf16.mxu0 %v5415_v54  ;;  %v1914_v35 = vld [vmem:[%s6278_s13 + $0x1d0] sm:$0xff]  ;;  %v1915_v15 = vld [vmem:[%s6278_s13 + $0x1d8] sm:$0xff]  ;;  %v5490_v62 = vpack.c.bf16 %v1897_v56, %v1896_v21  ;;  %v5492_v59 = vpack.c.bf16 %v1883_v36, %v1882_v10  ;;  %v1884_v27 = vld [vmem:[%s6278_s13 + $0xe0] sm:$0xff]  ;;  %v5600_v21 = vsub.s32 0, %v5477_v14 }
 0x2ed   : > { %4078 = vmatprep.subr.bf16.mxu1 %v5427_v18  ;;  %v1866_v38 = vld [vmem:[%s6278_s13 + $0x50] sm:$0xff]  ;;  %v1867_v47 = vld [vmem:[%s6278_s13 + $0x58] sm:$0xff]  ;;  %v5504_v6 = vpack.c.bf16 %v1915_v15, %v1914_v35  ;;  %v1885_v31 = vld [vmem:[%s6278_s13 + $0xe8] sm:$0xff]  ;;  %v5612_v35 = vsub.s32 2, %v5477_v14 }
 0x2ee   : > { %v1898_v19 = vld [vmem:[%s6278_s13 + $0x150] sm:$0xff]  ;;  %v1899_v45 = vld [vmem:[%s6278_s13 + $0x158] sm:$0xff]  ;;  %v1916_v48 = vld [vmem:[%s6278_s13 + $0x1e0] sm:$0xff]  ;;  %v5528_v24 = vpack.c.bf16 %v1867_v47, %v1866_v38  ;;  %v5537_v60 = vpack.c.bf16 %v1885_v31, %v1884_v27 }
 0x2ef   : > { %4048 = vmatpush3.bf16.msra.mxu0 %v5448_v0  ;;  %v1917_v46 = vld [vmem:[%s6278_s13 + $0x1e8] sm:$0xff]  ;;  %v1868_v29 = vld [vmem:[%s6278_s13 + $0x60] sm:$0xff]  ;;  %v5535_v51 = vpack.c.bf16 %v1899_v45, %v1898_v19  ;;  %v1886_v12 = vld [vmem:[%s6278_s13 + $0xf0] sm:$0xff] }
 0x2f0   : > { %4080 = vmatpush3.bf16.msra.mxu1 %v5452_v41  ;;  %4050 = vmatprep.subr.bf16.mxu0 %v5454_v37  ;;  %v1869_v3 = vld [vmem:[%s6278_s13 + $0x68] sm:$0xff]  ;;  %v1900_v4 = vld [vmem:[%s6278_s13 + $0x160] sm:$0xff]  ;;  %v5548_v57 = vpack.c.bf16 %v1917_v46, %v1916_v48  ;;  %v1887_v53 = vld [vmem:[%s6278_s13 + $0xf8] sm:$0xff] }
 0x2f1   : > { %4082 = vmatprep.subr.bf16.mxu1 %v5466_v17  ;;  %v5545_v8 = vld [vmem:[#allocation2] sm:$0xff]  ;;  %v1901_v11 = vld [vmem:[%s6278_s13 + $0x168] sm:$0xff]  ;;  %v1918_v58 = vld [vmem:[%s6278_s13 + $0x1f0] sm:$0xff]  ;;  %v5570_v43 = vpack.c.bf16 %v1869_v3, %v1868_v29  ;;  %v5576_v7 = vpack.c.bf16 %v1887_v53, %v1886_v12  ;;  %v5642_v29 = vsub.s32 5, %v5477_v14  ;;  %v5653_v12 = vsub.s32 7, %v5477_v14 }
 0x2f2   : > { %v1992_v52 = vrot.slane %v5545_v8, %v5516_v32  ;;  %v2000_v55 = vrot.slane %v5545_v8, %v5519_v40  ;;  %v1919_v20 = vld [vmem:[%s6278_s13 + $0x1f8] sm:$0xff]  ;;  %v5574_v26 = vpack.c.bf16 %v1901_v11, %v1900_v4  ;;  %v1870_v5 = vld [vmem:[%s6278_s13 + $0x70] sm:$0xff]  ;;  %v1936_v33 = vld [vmem:[%s6278_s13 + $0x280] sm:$0xff]  ;;  %v1988_v3 = vrot.slane %v5545_v8, %v5600_v21 }
 0x2f3   : > { %4052 = vmatpush3.bf16.msra.mxu0 %v5486_v39  ;;  %v1871_v9 = vld [vmem:[%s6278_s13 + $0x78] sm:$0xff]  ;;  %v1902_v30 = vld [vmem:[%s6278_s13 + $0x170] sm:$0xff]  ;;  %v5588_v2 = vpack.c.bf16 %v1919_v20, %v1918_v58  ;;  %v1937_v61 = vld [vmem:[%s6278_s13 + $0x288] sm:$0xff]  ;;  %v1996_v53 = vrot.slane %v5545_v8, %v5612_v35 }
 0x2f4   : > { %4084 = vmatpush3.bf16.msra.mxu1 %v5490_v62  ;;  %4054 = vmatprep.subr.bf16.mxu0 %v5492_v59  ;;  %v1903_v23 = vld [vmem:[%s6278_s13 + $0x178] sm:$0xff]  ;;  %v1968_v56 = vld [vmem:[%s6278_s13 + $0x380] sm:$0xff]  ;;  %v1969_v10 = vld [vmem:[%s6278_s13 + $0x388] sm:$0xff]  ;;  %v5609_v36 = vpack.c.bf16 %v1871_v9, %v1870_v5  ;;  %v5618_v38 = vpack.c.bf16 %v1937_v61, %v1936_v33 }
 0x2f5   : > { %4086 = vmatprep.subr.bf16.mxu1 %v5504_v6  ;;  %2089 = vmatprep.mubr.f32.mxu0 %v1992_v52  ;;  %v5616_v15 = vpack.c.bf16 %v1903_v23, %v1902_v30  ;;  %v1920_v47 = vld [vmem:[%s6278_s13 + $0x200] sm:$0xff]  ;;  %v1921_v19 = vld [vmem:[%s6278_s13 + $0x208] sm:$0xff]  ;;  %v5630_v27 = vpack.c.bf16 %v1969_v10, %v1968_v56  ;;  %v1938_v48 = vld [vmem:[%s6278_s13 + $0x290] sm:$0xff]  ;;  %v2008_v56 = vrot.slane %v5545_v8, %v5642_v29 }
 0x2f6   : > { %2159 = vmatprep.mubr.f32.mxu1 %v2000_v55  ;;  %v1952_v45 = vld [vmem:[%s6278_s13 + $0x300] sm:$0xff]  ;;  %v1953_v31 = vld [vmem:[%s6278_s13 + $0x308] sm:$0xff]  ;;  %v1939_v46 = vld [vmem:[%s6278_s13 + $0x298] sm:$0xff]  ;;  %v5658_v52 = vpack.c.bf16 %v1921_v19, %v1920_v47  ;;  %v2016_v19 = vrot.slane %v5545_v8, %v5653_v12 }
 0x2f7   : > { %4056 = vmatpush3.bf16.msra.mxu0 %v5528_v24  ;;  %v1970_v4 = vld [vmem:[%s6278_s13 + $0x390] sm:$0xff]  ;;  %v1971_v11 = vld [vmem:[%s6278_s13 + $0x398] sm:$0xff]  ;;  %v5662_v55 = vpack.c.bf16 %v1953_v31, %v1952_v45  ;;  %v5664_v58 = vpack.c.bf16 %v1939_v46, %v1938_v48  ;;  %v1940_v33 = vld [vmem:[%s6278_s13 + $0x2a0] sm:$0xff] }
 0x2f8   : > { %4088 = vmatpush3.bf16.msra.mxu1 %v5535_v51  ;;  %4058 = vmatprep.subr.bf16.mxu0 %v5537_v60  ;;  %v1922_v20 = vld [vmem:[%s6278_s13 + $0x210] sm:$0xff]  ;;  %v1923_v5 = vld [vmem:[%s6278_s13 + $0x218] sm:$0xff]  ;;  %v5676_v30 = vpack.c.bf16 %v1971_v11, %v1970_v4  ;;  %v1941_v61 = vld [vmem:[%s6278_s13 + $0x2a8] sm:$0xff] }
 0x2f9   : > { %4090 = vmatprep.subr.bf16.mxu1 %v5548_v57  ;;  %v1954_v9 = vld [vmem:[%s6278_s13 + $0x310] sm:$0xff]  ;;  %v1955_v23 = vld [vmem:[%s6278_s13 + $0x318] sm:$0xff]  ;;  %v1972_v10 = vld [vmem:[%s6278_s13 + $0x3a0] sm:$0xff]  ;;  %v5698_v45 = vpack.c.bf16 %v1923_v5, %v1922_v20  ;;  %v5704_v48 = vpack.c.bf16 %v1941_v61, %v1940_v33 }
 0x2fa   : > { %v1973_v47 = vld [vmem:[%s6278_s13 + $0x3a8] sm:$0xff]  ;;  %v5702_v31 = vpack.c.bf16 %v1955_v23, %v1954_v9  ;;  %v1924_v46 = vld [vmem:[%s6278_s13 + $0x220] sm:$0xff]  ;;  %v1942_v20 = vld [vmem:[%s6278_s13 + $0x2b0] sm:$0xff] }
 0x2fb   : > { %4060 = vmatpush3.bf16.msra.mxu0 %v5570_v43  ;;  %6280 = vst [vmem:[#allocation18_spill] sm:$0xff] %v5704_v48  ;;  %v1956_v4 = vld [vmem:[%s6278_s13 + $0x320] sm:$0xff]  ;;  %v5716_v11 = vpack.c.bf16 %v1973_v47, %v1972_v10  ;;  %v1943_v5 = vld [vmem:[%s6278_s13 + $0x2b8] sm:$0xff]  ;;  %v1974_v9 = vld [vmem:[%s6278_s13 + $0x3b0] sm:$0xff] }
 0x2fc   : > { %4092 = vmatpush3.bf16.msra.mxu1 %v5574_v26  ;;  %4062 = vmatprep.subr.bf16.mxu0 %v5576_v7  ;;  %6279 = vst [vmem:[#allocation17_spill] sm:$0xff] %v5702_v31  ;;  %v1975_v23 = vld [vmem:[%s6278_s13 + $0x3b8] sm:$0xff]  ;;  %v1926_v10 = vld [vmem:[%s6278_s13 + $0x230] sm:$0xff] }
 0x2fd   : > { %4094 = vmatprep.subr.bf16.mxu1 %v5588_v2  ;;  %6281 = vst [vmem:[#allocation19_spill] sm:$0xff] %v5716_v11  ;;  %v1927_v47 = vld [vmem:[%s6278_s13 + $0x238] sm:$0xff] }
 0x2ff   : > { %4064 = vmatpush3.bf16.msra.mxu0 %v5609_v36 }
 0x300   : > { %4096 = vmatpush3.bf16.msra.mxu1 %v5616_v15  ;;  %4098 = vmatprep.subr.bf16.mxu0 %v5618_v38 }
 0x301   : > { %4130 = vmatprep.subr.bf16.mxu1 %v5630_v27 }
 0x302   : > { %2090 = vmatmul.mubr.f32.vlgmr.msra.gmra.mrb[0].mxu0 %v1988_v3  ;;  %v1925_v3 = vld [vmem:[%s6278_s13 + $0x228] sm:$0xff] }
 0x303   : > { %2160 = vmatmul.mubr.f32.vlgmr.msra.gmra.mrb[0].mxu1 %v1996_v53  ;;  %4100 = vmatpush3.bf16.msra.mxu0 %v5658_v52  ;;  %v1957_v53 = vld [vmem:[%s6278_s13 + $0x328] sm:$0xff]  ;;  %v5734_v33 = vpack.c.bf16 %v1925_v3, %v1924_v46  ;;  %v5752_v46 = vpack.c.bf16 %v1975_v23, %v1974_v9  ;;  %v1959_v3 = vld [vmem:[%s6278_s13 + $0x338] sm:$0xff]  ;;  %v5770_v9 = vpack.c.bf16 %v1927_v47, %v1926_v10  ;;  %v1960_v10 = vld [vmem:[%s6278_s13 + $0x340] sm:$0xff] }
 0x304   : > { %4132 = vmatpush3.bf16.msra.mxu1 %v5662_v55  ;;  %4102 = vmatprep.subr.bf16.mxu0 %v5664_v58  ;;  %v5738_v61 = vpack.c.bf16 %v1957_v53, %v1956_v4  ;;  %v1944_v4 = vld [vmem:[%s6278_s13 + $0x2c0] sm:$0xff]  ;;  %v1945_v53 = vld [vmem:[%s6278_s13 + $0x2c8] sm:$0xff] }
 0x305   : > { %4134 = vmatprep.subr.bf16.mxu1 %v5676_v30  ;;  %2229 = vmatprep.mubr.f32.mxu0 %v2008_v56  ;;  %6282 = vst [vmem:[#allocation20_spill] sm:$0xff] %v5734_v33  ;;  %v5740_v56 = vpack.c.bf16 %v1943_v5, %v1942_v20  ;;  %6285 = vst [vmem:[#allocation23_spill] sm:$0xff] %v5752_v46  ;;  %v1976_v20 = vld [vmem:[%s6278_s13 + $0x3c0] sm:$0xff]  ;;  %v1977_v5 = vld [vmem:[%s6278_s13 + $0x3c8] sm:$0xff] }
 0x306   : > { %2299 = vmatprep.mubr.f32.mxu1 %v2016_v19  ;;  %6283 = vst [vmem:[#allocation21_spill] sm:$0xff] %v5738_v61  ;;  %v1958_v19 = vld [vmem:[%s6278_s13 + $0x330] sm:$0xff]  ;;  %6286 = vst [vmem:[#allocation24_spill] sm:$0xff] %v5770_v9  ;;  %v5788_v47 = vpack.c.bf16 %v1977_v5, %v1976_v20  ;;  %v1979_v20 = vld [vmem:[%s6278_s13 + $0x3d8] sm:$0xff] }
 0x307   : > { %4104 = vmatpush3.bf16.msra.mxu0 %v5698_v45  ;;  %6284 = vst [vmem:[#allocation22_spill] sm:$0xff] %v5740_v56  ;;  %v5774_v23 = vpack.c.bf16 %v1959_v3, %v1958_v19  ;;  %v1961_v19 = vld [vmem:[%s6278_s13 + $0x348] sm:$0xff]  ;;  %v1946_v3 = vld [vmem:[%s6278_s13 + $0x2d0] sm:$0xff] }
 0x308   : > { %4136 = vmatpush3.bf16.msra.mxu1 %v5702_v31  ;;  %4106 = vmatprep.subr.bf16.mxu0 %v5704_v48  ;;  %v1928_v48 = vld [vmem:[%s6278_s13 + $0x240] sm:$0xff]  ;;  %v1929_v31 = vld [vmem:[%s6278_s13 + $0x248] sm:$0xff]  ;;  %6289 = vst [vmem:[#allocation27_spill] sm:$0xff] %v5788_v47 }
 0x309   : > { %4138 = vmatprep.subr.bf16.mxu1 %v5716_v11  ;;  %6287 = vst [vmem:[#allocation25_spill] sm:$0xff] %v5774_v23  ;;  %v5776_v11 = vpack.c.bf16 %v1945_v53, %v1944_v4  ;;  %v1947_v4 = vld [vmem:[%s6278_s13 + $0x2d8] sm:$0xff]  ;;  %v1978_v53 = vld [vmem:[%s6278_s13 + $0x3d0] sm:$0xff]  ;;  %v5806_v5 = vpack.c.bf16 %v1929_v31, %v1928_v48 }
 0x30a   : > { %v1962_v31 = vld [vmem:[%s6278_s13 + $0x350] sm:$0xff]  ;;  %v5824_v48 = vpack.c.bf16 %v1979_v20, %v1978_v53  ;;  %v1981_v53 = vld [vmem:[%s6278_s13 + $0x3e8] sm:$0xff] }
 0x30b   : > { %4108 = vmatpush3.bf16.msra.mxu0 %v5734_v33  ;;  %6288 = vst [vmem:[#allocation26_spill] sm:$0xff] %v5776_v11  ;;  %6290 = vst [vmem:[#allocation28_spill] sm:$0xff] %v5806_v5  ;;  %v1931_v33 = vld [vmem:[%s6278_s13 + $0x258] sm:$0xff] }
 0x30c   : > { %4140 = vmatpush3.bf16.msra.mxu1 %v5738_v61  ;;  %4110 = vmatprep.subr.bf16.mxu0 %v5740_v56  ;;  %v5812_v56 = vpack.c.bf16 %v1947_v4, %v1946_v3  ;;  %v1930_v61 = vld [vmem:[%s6278_s13 + $0x250] sm:$0xff]  ;;  %6293 = vst [vmem:[#allocation31_spill] sm:$0xff] %v5824_v48  ;;  %v1949_v3 = vld [vmem:[%s6278_s13 + $0x2e8] sm:$0xff]  ;;  %v1980_v4 = vld [vmem:[%s6278_s13 + $0x3e0] sm:$0xff] }
 0x30d   : > { %4142 = vmatprep.subr.bf16.mxu1 %v5752_v46  ;;  %v5810_v46 = vpack.c.bf16 %v1961_v19, %v1960_v10  ;;  %v1963_v10 = vld [vmem:[%s6278_s13 + $0x358] sm:$0xff]  ;;  %v1948_v19 = vld [vmem:[%s6278_s13 + $0x2e0] sm:$0xff]  ;;  %v5842_v20 = vpack.c.bf16 %v1931_v33, %v1930_v61  ;;  %v5860_v61 = vpack.c.bf16 %v1981_v53, %v1980_v4 }
 0x30e   : > { %6292 = vst [vmem:[#allocation30_spill] sm:$0xff] %v5812_v56  ;;  %v1964_v33 = vld [vmem:[%s6278_s13 + $0x360] sm:$0xff]  ;;  %v1983_v4 = vld [vmem:[%s6278_s13 + $0x3f8] sm:$0xff] }
 0x30f   : > { %4112 = vmatpush3.bf16.msra.mxu0 %v5770_v9  ;;  %6291 = vst [vmem:[#allocation29_spill] sm:$0xff] %v5810_v46  ;;  %v1933_v9 = vld [vmem:[%s6278_s13 + $0x268] sm:$0xff]  ;;  %6294 = vst [vmem:[#allocation32_spill] sm:$0xff] %v5860_v61 }
 0x310   : > { %4144 = vmatpush3.bf16.msra.mxu1 %v5774_v23  ;;  %4114 = vmatprep.subr.bf16.mxu0 %v5776_v11  ;;  %v5848_v11 = vpack.c.bf16 %v1949_v3, %v1948_v19  ;;  %v1932_v23 = vld [vmem:[%s6278_s13 + $0x260] sm:$0xff]  ;;  %v1951_v19 = vld [vmem:[%s6278_s13 + $0x2f8] sm:$0xff]  ;;  %v1982_v3 = vld [vmem:[%s6278_s13 + $0x3f0] sm:$0xff] }
 0x311   : > { %4146 = vmatprep.subr.bf16.mxu1 %v5788_v47  ;;  %v5846_v47 = vpack.c.bf16 %v1963_v10, %v1962_v31  ;;  %v1965_v31 = vld [vmem:[%s6278_s13 + $0x368] sm:$0xff]  ;;  %v1950_v10 = vld [vmem:[%s6278_s13 + $0x2f0] sm:$0xff]  ;;  %v5878_v53 = vpack.c.bf16 %v1933_v9, %v1932_v23  ;;  %v5893_v9 = vpack.c.bf16 %v1983_v4, %v1982_v3 }
 0x312   : > { %v1966_v23 = vld [vmem:[%s6278_s13 + $0x370] sm:$0xff] }
 0x313   : > { %4116 = vmatpush3.bf16.msra.mxu0 %v5806_v5  ;;  %v1935_v5 = vld [vmem:[%s6278_s13 + $0x278] sm:$0xff] }
 0x314   : > { %4148 = vmatpush3.bf16.msra.mxu1 %v5810_v46  ;;  %4118 = vmatprep.subr.bf16.mxu0 %v5812_v56  ;;  %v5884_v56 = vpack.c.bf16 %v1951_v19, %v1950_v10  ;;  %v1934_v46 = vld [vmem:[%s6278_s13 + $0x270] sm:$0xff]  ;;  %v5908_v19 = vsub.s32 6, %v5477_v14 }
 0x315   : > { %4150 = vmatprep.subr.bf16.mxu1 %v5824_v48  ;;  %v5882_v48 = vpack.c.bf16 %v1965_v31, %v1964_v33  ;;  %v1967_v33 = vld [vmem:[%s6278_s13 + $0x378] sm:$0xff]  ;;  %v5902_v31 = vsub.s32 4, %v5477_v14  ;;  %v5905_v10 = vpack.c.bf16 %v1935_v5, %v1934_v46 }
 0x316   : > { %v5912_v3 = vpack.c.bf16 %v1967_v33, %v1966_v23  ;;  %v2012_v46 = vrot.slane %v5545_v8, %v5908_v19 }
 0x317   : > { %4120 = vmatpush3.bf16.msra.mxu0 %v5842_v20  ;;  %v2004_v4 = vrot.slane %v5545_v8, %v5902_v31 }
 0x318   : > { %4152 = vmatpush3.bf16.msra.mxu1 %v5846_v47  ;;  %4122 = vmatprep.subr.bf16.mxu0 %v5848_v11 }
 0x319   : > { %4154 = vmatprep.subr.bf16.mxu1 %v5860_v61  ;;  %v5917_v61 = vld [vmem:[#allocation3] sm:$0xff] }
 0x31a   : > { %v2314_v5 = vrot.slane %v5917_v61, %v5516_v32  ;;  %v2322_v23 = vrot.slane %v5917_v61, %v5519_v40 }
 0x31b   : > { %4124 = vmatpush3.bf16.msra.mxu0 %v5878_v53 }
 0x31c   : > { %4156 = vmatpush3.bf16.msra.mxu1 %v5882_v48  ;;  %4126 = vmatprep.subr.bf16.mxu0 %v5884_v56 }
 0x31d   : > { %4158 = vmatprep.subr.bf16.mxu1 %v5893_v9 }
 0x31f   : > { %4128 = vmatpush3.bf16.msra.mxu0 %v5905_v10 }
 0x320   : > { %4160 = vmatpush3.bf16.msra.mxu1 %v5912_v3  ;;  %4162 = vmatprep.subr.bf16.mxu0 %v5310_v25  ;;  %v2310_v25 = vrot.slane %v5917_v61, %v5600_v21 }
 0x321   : > { %4194 = vmatprep.subr.bf16.mxu1 %v5321_v50  ;;  %v2318_v50 = vrot.slane %v5917_v61, %v5612_v35 }
 0x322   : > { %2230 = vmatmul.mubr.f32.vlgmr.msra.gmra.mrb[2].mxu0 %v2004_v4 }
 0x323   : > { %2300 = vmatmul.mubr.f32.vlgmr.msra.gmra.mrb[2].mxu1 %v2012_v46  ;;  %4164 = vmatpush3.bf16.msra.mxu0 %v5323_v22  ;;  %v2330_v22 = vrot.slane %v5917_v61, %v5642_v29 }
 0x324   : > { %4196 = vmatpush3.bf16.msra.mxu1 %v5335_v49  ;;  %4166 = vmatprep.subr.bf16.mxu0 %v5348_v42  ;;  %v2338_v49 = vrot.slane %v5917_v61, %v5653_v12  ;;  %v6295_v42 = vld [vmem:[#allocation17_spill] sm:$0xff] }
 0x325   : > { %4198 = vmatprep.subr.bf16.mxu1 %v5350_v34  ;;  %2411 = vmatprep.mubr.f32.mxu0 %v2314_v5  ;;  %v6296_v34 = vld [vmem:[#allocation18_spill] sm:$0xff] }
 0x326   : > { %2481 = vmatprep.mubr.f32.mxu1 %v2322_v23  ;;  %v2637_v23 = vld [vmem:[%s6311_s17 + $0x20] sm:$0xff] }
 0x327   : > { %4168 = vmatpush3.bf16.msra.mxu0 %v5362_v63  ;;  %v6297_v63 = vld [vmem:[#allocation19_spill] sm:$0xff] }
 0x328   : > { %4200 = vmatpush3.bf16.msra.mxu1 %v5375_v44  ;;  %4170 = vmatprep.subr.bf16.mxu0 %v5377_v16  ;;  %v6298_v44 = vld [vmem:[#allocation20_spill] sm:$0xff]  ;;  %v6299_v16 = vld [vmem:[#allocation21_spill] sm:$0xff] }
 0x329   : > { %4202 = vmatprep.subr.bf16.mxu1 %v5388_v28  ;;  %v6300_v28 = vld [vmem:[#allocation22_spill] sm:$0xff] }
 0x32b   : > { %4172 = vmatpush3.bf16.msra.mxu0 %v5400_v1  ;;  %v6301_v1 = vld [vmem:[#allocation23_spill] sm:$0xff] }
 0x32c   : > { %4204 = vmatpush3.bf16.msra.mxu1 %v5413_v13  ;;  %4174 = vmatprep.subr.bf16.mxu0 %v5415_v54  ;;  %v6302_v13 = vld [vmem:[#allocation24_spill] sm:$0xff]  ;;  %v6303_v54 = vld [vmem:[#allocation25_spill] sm:$0xff] }
 0x32d   : > { %4206 = vmatprep.subr.bf16.mxu1 %v5427_v18  ;;  %v6304_v18 = vld [vmem:[#allocation26_spill] sm:$0xff] }
 0x32f   : > { %4176 = vmatpush3.bf16.msra.mxu0 %v5448_v0  ;;  %v6305_v0 = vld [vmem:[#allocation27_spill] sm:$0xff] }
 0x330   : > { %4208 = vmatpush3.bf16.msra.mxu1 %v5452_v41  ;;  %4178 = vmatprep.subr.bf16.mxu0 %v5454_v37  ;;  %v6306_v41 = vld [vmem:[#allocation28_spill] sm:$0xff]  ;;  %v6307_v37 = vld [vmem:[#allocation29_spill] sm:$0xff] }
 0x331   : > { %4210 = vmatprep.subr.bf16.mxu1 %v5466_v17  ;;  %v6308_v17 = vld [vmem:[#allocation30_spill] sm:$0xff] }
 0x333   : > { %4180 = vmatpush3.bf16.msra.mxu0 %v5486_v39  ;;  %v6309_v39 = vld [vmem:[#allocation31_spill] sm:$0xff] }
 0x334   : > { %4212 = vmatpush3.bf16.msra.mxu1 %v5490_v62  ;;  %4182 = vmatprep.subr.bf16.mxu0 %v5492_v59  ;;  %v6310_v62 = vld [vmem:[#allocation32_spill] sm:$0xff]  ;;  %v2326_v59 = vrot.slane %v5917_v61, %v5902_v31 }
 0x335   : > { %4214 = vmatprep.subr.bf16.mxu1 %v5504_v6  ;;  %v2334_v6 = vrot.slane %v5917_v61, %v5908_v19 }
 0x337   : > { %4184 = vmatpush3.bf16.msra.mxu0 %v5528_v24  ;;  %v2634_v24 = vld [vmem:[%s6311_s17 + $0x8] sm:$0xff] }
 0x338   : > { %4216 = vmatpush3.bf16.msra.mxu1 %v5535_v51  ;;  %4186 = vmatprep.subr.bf16.mxu0 %v5537_v60  ;;  %v2642_v51 = vld [vmem:[%s6311_s17 + $0x48] sm:$0xff]  ;;  %v2636_v60 = vld [vmem:[%s6311_s17 + $0x18] sm:$0xff] }
 0x339   : > { %4218 = vmatprep.subr.bf16.mxu1 %v5548_v57  ;;  %v4289_v8 = vpack.c.bf16 %v2642_v51, %v2634_v24  ;;  %v2644_v57 = vld [vmem:[%s6311_s17 + $0x58] sm:$0xff] }
 0x33b   : > { %4188 = vmatpush3.bf16.msra.mxu0 %v5570_v43  ;;  %v2633_v43 = vld [vmem:[%s6311_s17] sm:$0xff] }
 0x33c   : > { %4220 = vmatpush3.bf16.msra.mxu1 %v5574_v26  ;;  %4190 = vmatprep.subr.bf16.mxu0 %v5576_v7  ;;  %v2641_v26 = vld [vmem:[%s6311_s17 + $0x40] sm:$0xff]  ;;  %v4293_v7 = vpack.c.bf16 %v2644_v57, %v2636_v60 }
 0x33d   : > { %4222 = vmatprep.subr.bf16.mxu1 %v5588_v2  ;;  %v4291_v2 = vpack.c.bf16 %v2641_v26, %v2633_v43 }
 0x33f   : > { %4192 = vmatpush3.bf16.msra.mxu0 %v5609_v36  ;;  %v2635_v36 = vld [vmem:[%s6311_s17 + $0x10] sm:$0xff] }
 0x340   : > { %4224 = vmatpush3.bf16.msra.mxu1 %v5616_v15  ;;  %4226 = vmatprep.subr.bf16.mxu0 %v5618_v38  ;;  %v2643_v15 = vld [vmem:[%s6311_s17 + $0x50] sm:$0xff] }
 0x341   : > { %4258 = vmatprep.subr.bf16.mxu1 %v5630_v27  ;;  %v4295_v38 = vpack.c.bf16 %v2643_v15, %v2635_v36  ;;  %v2638_v27 = vld [vmem:[%s6311_s17 + $0x28] sm:$0xff] }
 0x342   : > { %2412 = vmatmul.mubr.f32.vlgmr.msra.gmra.mrb[4].mxu0 %v2310_v25 }
 0x343   : > { %2482 = vmatmul.mubr.f32.vlgmr.msra.gmra.mrb[4].mxu1 %v2318_v50  ;;  %4228 = vmatpush3.bf16.msra.mxu0 %v5658_v52  ;;  %v2646_v52 = vld [vmem:[%s6311_s17 + $0x68] sm:$0xff]  ;;  %v2645_v50 = vld [vmem:[%s6311_s17 + $0x60] sm:$0xff] }
 0x344   : > { %4260 = vmatpush3.bf16.msra.mxu1 %v5662_v55  ;;  %4230 = vmatprep.subr.bf16.mxu0 %v5664_v58  ;;  %v2640_v55 = vld [vmem:[%s6311_s17 + $0x38] sm:$0xff]  ;;  %v4597_v58 = vmov 0.0  }
 0x345   : > { %4262 = vmatprep.subr.bf16.mxu1 %v5676_v30  ;;  %2551 = vmatprep.mubr.f32.mxu0 %v2330_v22  ;;  %v4297_v30 = vpack.c.bf16 %v2646_v52, %v2638_v27  ;;  %v2639_v22 = vld [vmem:[%s6311_s17 + $0x30] sm:$0xff] }
 0x346   : > { %2621 = vmatprep.mubr.f32.mxu1 %v2338_v49  ;;  %v2647_v49 = vld [vmem:[%s6311_s17 + $0x70] sm:$0xff] }
 0x347   : > { %4232 = vmatpush3.bf16.msra.mxu0 %v5698_v45  ;;  %v2648_v45 = vld [vmem:[%s6311_s17 + $0x78] sm:$0xff] }
 0x348   : > { %4264 = vmatpush3.bf16.msra.mxu1 %v6295_v42  ;;  %4234 = vmatprep.subr.bf16.mxu0 %v6296_v34  ;;  %v4299_v34 = vpack.c.bf16 %v2645_v50, %v2637_v23 }
 0x349   : > { %4266 = vmatprep.subr.bf16.mxu1 %v6297_v63  ;;  %v4303_v63 = vpack.c.bf16 %v2647_v49, %v2639_v22 }
 0x34b   : > { %4236 = vmatpush3.bf16.msra.mxu0 %v6298_v44 }
 0x34c   : > { %4268 = vmatpush3.bf16.msra.mxu1 %v6299_v16  ;;  %4238 = vmatprep.subr.bf16.mxu0 %v6300_v28 }
 0x34d   : > { %4270 = vmatprep.subr.bf16.mxu1 %v6301_v1 }
 0x34f   : > { %4240 = vmatpush3.bf16.msra.mxu0 %v6302_v13 }
 0x350   : > { %4272 = vmatpush3.bf16.msra.mxu1 %v6303_v54  ;;  %4242 = vmatprep.subr.bf16.mxu0 %v6304_v18 }
 0x351   : > { %4274 = vmatprep.subr.bf16.mxu1 %v6305_v0 }
 0x353   : > { %4244 = vmatpush3.bf16.msra.mxu0 %v6306_v41 }
 0x354   : > { %4276 = vmatpush3.bf16.msra.mxu1 %v6307_v37  ;;  %4246 = vmatprep.subr.bf16.mxu0 %v6308_v17 }
 0x355   : > { %4278 = vmatprep.subr.bf16.mxu1 %v6309_v39 }
 0x357   : > { %4248 = vmatpush3.bf16.msra.mxu0 %v5842_v20 }
 0x358   : > { %4280 = vmatpush3.bf16.msra.mxu1 %v5846_v47  ;;  %4250 = vmatprep.subr.bf16.mxu0 %v5848_v11  ;;  %v4301_v11 = vpack.c.bf16 %v2648_v45, %v2640_v55 }
 0x359   : > { %4282 = vmatprep.subr.bf16.mxu1 %v6310_v62 }
 0x35b   : > { %4252 = vmatpush3.bf16.msra.mxu0 %v5878_v53 }
 0x35c   : > { %4284 = vmatpush3.bf16.msra.mxu1 %v5882_v48  ;;  %4254 = vmatprep.subr.bf16.mxu0 %v5884_v56 }
 0x35d   : > { %4286 = vmatprep.subr.bf16.mxu1 %v5893_v9 }
 0x35f   : > { %4256 = vmatpush3.bf16.msra.mxu0 %v5905_v10 }
 0x360   : > { %4288 = vmatpush3.bf16.msra.mxu1 %v5912_v3  ;;  %4290 = vmatprep.subr.bf16.mxu0 %v4289_v8 }
 0x361   : > { %4294 = vmatprep.subr.bf16.mxu1 %v4293_v7 }
 0x362   : > { %2552 = vmatmul.mubr.f32.vlgmr.msra.gmra.mrb[6].mxu0 %v2326_v59 }
 0x363   : > { %2622 = vmatmul.mubr.f32.vlgmr.msra.gmra.mrb[6].mxu1 %v2334_v6  ;;  %4292 = vmatpush1.bf16.msra.mxu0 %v4291_v2 }
 0x364   : > { %4296 = vmatpush1.bf16.msra.mxu1 %v4295_v38  ;;  %2717 = vmatprep.mubr.f32.mxu0 %v4597_v58 }
 0x365   : > { %2788 = vmatprep.mubr.f32.mxu1 %v4597_v58  ;;  %4298 = vmatprep.subr.bf16.mxu0 %v4297_v30 }
 0x366   : > { %4302 = vmatprep.subr.bf16.mxu1 %v4301_v11 }
 0x3d5   : > { %v3785_v56 = vpop.f32.mrb[0].mxu0 }
 0x3d6   : > { %v3820_v47 = vpop.f32.mrb[0].mxu1  ;;  %v3786_v48 = vpop.f32.mrb[1].mxu0 }
 0x3d7   : > { %v3787_v20 = vadd.f32 %v3786_v48, %v3785_v56  ;;  %v3821_v61 = vpop.f32.mrb[1].mxu1 }
 0x3d8   : > { %v3822_v53 = vadd.f32 %v3821_v61, %v3820_v47 }
 0x3da   : > { %v2162_v9 = vadd.f32 %v3822_v53, %v3787_v20 }
 0x3f5   : > { %v3855_v33 = vpop.f32.mrb[2].mxu0 }
 0x3f6   : > { %v3856_v10 = vpop.f32.mrb[3].mxu0  ;;  %v3890_v3 = vpop.f32.mrb[2].mxu1 }
 0x3f7   : > { %v3857_v4 = vadd.f32 %v3856_v10, %v3855_v33  ;;  %v3891_v46 = vpop.f32.mrb[3].mxu1 }
 0x3f8   : > { %v3892_v5 = vadd.f32 %v3891_v46, %v3890_v3 }
 0x3f9   : > { %v2232_v25 = vadd.f32 %v3857_v4, %v2162_v9 }
 0x3fb   : > { %v2302_v42 = vadd.f32 %v3892_v5, %v2232_v25 }
 0x3fd   : > { %v2305_v44 = vmul.f32 0.00048828125, %v2302_v42 }
 0x3ff   : > { %3741 = vmatmul.mubr.msk.f32.vlgmr.msra.gmra.mrb[8].mxu0 %vm2649_vm2, %v2305_v44  ;;  %3742 = vmatmul.mubr.msk.f32.vlgmr.msra.gmra.mrb[8].mxu1 %vm2649_vm2, %v2305_v44  ;;  %v2628_v60 = vmul.f32 %v2305_v44, %v2305_v44 }
 0x400   : > { %4300 = vmatpush1.bf16.msra.mxu0 %v4299_v34  ;;  %4304 = vmatpush1.bf16.msra.mxu1 %v4303_v63 }
 0x401   : > { %2859 = vmatprep.mubr.f32.mxu0 %v4597_v58  ;;  %2930 = vmatprep.mubr.f32.mxu1 %v4597_v58 }
 0x402   : > { %4306 = vmatprep.subr.bf16.mxu0 %v4289_v8  ;;  %4310 = vmatprep.subr.bf16.mxu1 %v4293_v7 }
 0x403   : > { %3743 = vmatmul.mubr.msk.f32.vlgmr.msra.gmra.mrb[10].mxu0 %vm2649_vm2, %v2305_v44  ;;  %3744 = vmatmul.mubr.msk.f32.vlgmr.msra.gmra.mrb[10].mxu1 %vm2649_vm2, %v2305_v44 }
 0x404   : > { %4308 = vmatpush1.bf16.msra.mxu0 %v4291_v2  ;;  %4312 = vmatpush1.bf16.msra.mxu1 %v4295_v38 }
 0x405   : > { %3004 = vmatprep.mubr.f32.mxu0 %v4597_v58  ;;  %3075 = vmatprep.mubr.f32.mxu1 %v4597_v58 }
 0x406   : > { %4314 = vmatprep.subr.bf16.mxu0 %v4297_v30  ;;  %4318 = vmatprep.subr.bf16.mxu1 %v4301_v11  ;;  %v3749_v30 = vld [vmem:[%s6312_s16 + $0x2] ss:$4 sm:$0xff]  ;;  %v4598_v11 = vmov 1966171168  }
 0x407   : > { %v3232_v45 = vrot.slane %v3749_v30, %v5600_v21  ;;  %v3298_v56 = vunpack.c.l.s4 %v4598_v11  ;;  %v3236_v47 = vrot.slane %v3749_v30, %v5516_v32  ;;  %v3244_v48 = vrot.slane %v3749_v30, %v5519_v40 }
 0x408   : > { %v3248_v23 = vrot.slane %v3749_v30, %v5902_v31  ;;  %v3256_v49 = vrot.slane %v3749_v30, %v5908_v19  ;;  %v3252_v42 = vrot.slane %v3749_v30, %v5642_v29 }
 0x409   : > { %v3299_v10 = vunpack.c.0.s8 %v3298_v56 }
 0x415   : > { %v3925_v16 = vpop.f32.mrb[4].mxu0 }
 0x416   : > { %v3960_v28 = vpop.f32.mrb[4].mxu1  ;;  %v3926_v1 = vpop.f32.mrb[5].mxu0 }
 0x417   : > { %v3927_v13 = vadd.f32 %v3926_v1, %v3925_v16  ;;  %v3961_v54 = vpop.f32.mrb[5].mxu1 }
 0x418   : > { %v3962_v18 = vadd.f32 %v3961_v54, %v3960_v28 }
 0x41a   : > { %v2484_v0 = vadd.f32 %v3962_v18, %v3927_v13 }
 0x435   : > { %v3995_v41 = vpop.f32.mrb[6].mxu0 }
 0x436   : > { %v3996_v37 = vpop.f32.mrb[7].mxu0  ;;  %v4030_v17 = vpop.f32.mrb[6].mxu1 }
 0x437   : > { %v3997_v39 = vadd.f32 %v3996_v37, %v3995_v41  ;;  %v4031_v62 = vpop.f32.mrb[7].mxu1 }
 0x438   : > { %v4032_v59 = vadd.f32 %v4031_v62, %v4030_v17  ;;  %v3260_v17 = vrot.slane %v3749_v30, %v5653_v12  ;;  %v3352_v62 = vld [vmem:[#allocation4] sm:$0xff] }
 0x439   : > { %v2554_v6 = vadd.f32 %v3997_v39, %v2484_v0  ;;  %v3377_v11 = vrot.slane %v3352_v62, %v5642_v29 }
 0x43b   : > { %v2624_v24 = vadd.f32 %v4032_v59, %v2554_v6  ;;  %v3402_v59 = vld [vmem:[#allocation5] sm:$0xff] }
 0x43d   : > { %v2627_v51 = vmul.f32 0.00048828125, %v2624_v24 }
 0x43f   : > { %v2629_v8 = vsub.f32 %v2627_v51, %v2628_v60 }
 0x441   : > { %v2630_v57 = vmax.f32 %v2629_v8, 0.0  ;;  %v3357_v8 = vrot.slane %v3352_v62, %v5600_v21 }
 0x443   : > { %v2631_v43 = vadd.f32 1e-05, %v2630_v57  ;;  %v3407_v57 = vrot.slane %v3402_v59, %v5600_v21 }
 0x445   : > { %4430 = vrsqrt.f32 %v2631_v43  ;;  %v3365_v43 = vrot.slane %v3352_v62, %v5612_v35 }
 0x44f   : > { %v4431_v26 = vpop.eup %4430 }
 0x450   : > { %3745 = vmatmul.mubr.msk.f32.vlgmr.msra.gmra.mrb[12].mxu0 %vm2649_vm2, %v4431_v26  ;;  %3746 = vmatmul.mubr.msk.f32.vlgmr.msra.gmra.mrb[12].mxu1 %vm2649_vm2, %v4431_v26 }
 0x451   : > { %4316 = vmatpush1.bf16.msra.mxu0 %v4299_v34  ;;  %4320 = vmatpush1.bf16.msra.mxu1 %v4303_v63  ;;  %v6089_v63 = vsub.s32 %v3299_v10, %v5477_v14 }
 0x452   : > { %3146 = vmatprep.mubr.f32.mxu0 %v4597_v58  ;;  %3217 = vmatprep.mubr.f32.mxu1 %v4597_v58  ;;  %v3240_v58 = vrot.slane %v3749_v30, %v5612_v35  ;;  %v3381_v30 = vrot.slane %v3352_v62, %v5908_v19 }
 0x454   : > { %3747 = vmatmul.mubr.msk.f32.vlgmr.msra.gmra.mrb[14].mxu0 %vm2649_vm2, %v4431_v26  ;;  %3748 = vmatmul.mubr.msk.f32.vlgmr.msra.gmra.mrb[14].mxu1 %vm2649_vm2, %v4431_v26  ;;  %v3415_v26 = vrot.slane %v3402_v59, %v5612_v35 }
 0x4d2   : > { %v2719_v7 = vpop.f32.mrb[8].mxu0  ;;  %v2790_v2 = vpop.f32.mrb[8].mxu1 }
 0x4d3   : > { %v2721_v36 = vpop.f32.mrb[9].mxu0  ;;  %v2792_v15 = vpop.f32.mrb[9].mxu1 }
 0x4d6   : > { %v2861_v38 = vpop.f32.mrb[10].mxu0  ;;  %v2932_v27 = vpop.f32.mrb[10].mxu1 }
 0x4d7   : > { %v2863_v52 = vpop.f32.mrb[11].mxu0  ;;  %v2934_v55 = vpop.f32.mrb[11].mxu1 }
 0x523   : > { %v3006_v20 = vpop.f32.mrb[12].mxu0  ;;  %v3077_v61 = vpop.f32.mrb[12].mxu1 }
 0x524   : > { %v6074_v53 = vmul.f32 %v3232_v45, %v3006_v20  ;;  %v6076_v9 = vmul.f32 %v3240_v58, %v3077_v61  ;;  %v3008_v33 = vpop.f32.mrb[13].mxu0  ;;  %v3079_v3 = vpop.f32.mrb[13].mxu1  ;;  %v3431_v45 = vrot.slane %v3402_v59, %v5908_v19 }
 0x525   : > { %v6078_v4 = vmul.f32 %v3236_v47, %v3008_v33  ;;  %v6080_v46 = vmul.f32 %v3244_v48, %v3079_v3  ;;  %v3427_v47 = vrot.slane %v3402_v59, %v5642_v29  ;;  %v3435_v48 = vrot.slane %v3402_v59, %v5653_v12 }
 0x526   : > { %v3277_v5 = vmul.f32 %v6074_v53, %v2719_v7  ;;  %v3279_v25 = vmul.f32 %v6076_v9, %v2790_v2  ;;  %v3361_v7 = vrot.slane %v3352_v62, %v5516_v32  ;;  %v3411_v2 = vrot.slane %v3402_v59, %v5516_v32 }
 0x527   : > { %v3148_v50 = vpop.f32.mrb[14].mxu0  ;;  %v3219_v22 = vpop.f32.mrb[14].mxu1  ;;  %v3278_v34 = vmul.f32 %v6078_v4, %v2721_v36  ;;  %v3280_v28 = vmul.f32 %v6080_v46, %v2792_v15  ;;  %v3369_v36 = vrot.slane %v3352_v62, %v5519_v40  ;;  %vm3344_vm3 = vcmp.ge.f32.partialorder %v6074_v53, 0.0 }
 0x528   : > { %v3150_v44 = vpop.f32.mrb[15].mxu0  ;;  %v3221_v16 = vpop.f32.mrb[15].mxu1  ;;  %v6092_v13 = vmul.f32 %v3248_v23, %v3148_v50  ;;  %v6094_v18 = vmul.f32 %v3256_v49, %v3219_v22  ;;  %v3394_v20 = vmul.f32 %v3357_v8, %v6074_v53  ;;  %v3444_v61 = vmul.f32 %v3407_v57, %v6074_v53 }
 0x529   : > { %v3293_v1 = vcombine.low %v3277_v5, %v3278_v34  ;;  %v3294_v54 = vcombine.low %v3279_v25, %v3280_v28  ;;  %v6096_v0 = vmul.f32 %v3252_v42, %v3150_v44  ;;  %v3276_v60 = vmul.f32 %v3260_v17, %v3221_v16 }
 0x52a   : > { %v3281_v37 = vmul.f32 %v6092_v13, %v2861_v38  ;;  %v3283_v39 = vmul.f32 %v6094_v18, %v2932_v27  ;;  %v3419_v38 = vrot.slane %v3402_v59, %v5519_v40  ;;  %v3373_v27 = vrot.slane %v3352_v62, %v5902_v31 }
 0x52b   : > { %v3303_v41 = vrot.slane %v3293_v1, %v6089_v63  ;;  %v3310_v14 = vrot.slane %v3294_v54, %v6089_v63  ;;  %v3282_v6 = vmul.f32 %v6096_v0, %v2863_v52  ;;  %v3284_v15 = vmul.f32 %v3276_v60, %v2934_v55 }
 0x52c   : > { %v3423_v52 = vrot.slane %v3402_v59, %v5902_v31  ;;  %v3385_v55 = vrot.slane %v3352_v62, %v5653_v12  ;;  %vm3346_vm4 = vcmp.ge.f32.partialorder %v6076_v9, 0.0  ;;  %v3396_v10 = vmul.f32 %v3365_v43, %v6076_v9 }
 0x52d   : > { %v3325_v24 = vcombine.low %v3303_v41, %v3310_v14  ;;  %v3295_v51 = vcombine.low %v3281_v37, %v3282_v6  ;;  %v3296_v56 = vcombine.low %v3283_v39, %v3284_v15  ;;  %v3446_v3 = vmul.f32 %v3415_v26, %v6076_v9  ;;  %v3750_v41 = vld [vmem:[%s6312_s16 + $0x3] ss:$4 sm:$0xff] }
 0x52e   : > { %vm3345_vm5 = vcmp.ge.f32.partialorder %v6078_v4, 0.0  ;;  %v3395_v5 = vmul.f32 %v3361_v7, %v6078_v4  ;;  %v3445_v23 = vmul.f32 %v3411_v2, %v6078_v4  ;;  %vm3347_vm6 = vcmp.ge.f32.partialorder %v6080_v46, 0.0 }
 0x52f   : > { %v3317_v58 = vrot.slane %v3295_v51, %v6089_v63  ;;  %v3324_v33 = vrot.slane %v3296_v56, %v6089_v63  ;;  %v3397_v25 = vmul.f32 %v3369_v36, %v6080_v46  ;;  %v3447_v22 = vmul.f32 %v3419_v38, %v6080_v46 }
 0x530   : > { %vm3348_vm7 = vcmp.ge.f32.partialorder %v6092_v13, 0.0  ;;  %v3398_v49 = vmul.f32 %v3373_v27, %v6092_v13  ;;  %v3448_v42 = vmul.f32 %v3423_v52, %v6092_v13  ;;  %v3333_v34 = vrot.slane %v3325_v24, %v6089_v63 }
 0x531   : > { %v3326_v50 = vcombine.low %v3317_v58, %v3324_v33  ;;  %v3400_v44 = vmul.f32 %v3381_v30, %v6094_v18  ;;  %v3450_v16 = vmul.f32 %v3431_v45, %v6094_v18  ;;  %v3399_v1 = vmul.f32 %v3377_v11, %v6096_v0 }
 0x532   : > { %v3449_v54 = vmul.f32 %v3427_v47, %v6096_v0  ;;  %v3401_v37 = vmul.f32 %v3385_v55, %v3276_v60  ;;  %v3451_v17 = vmul.f32 %v3435_v48, %v3276_v60  ;;  %vm3350_vm8 = vcmp.ge.f32.partialorder %v6094_v18, 0.0 }
 0x533   : > { %v3340_v28 = vrot.slane %v3326_v50, %v6089_v63  ;;  %vm3349_vm9 = vcmp.ge.f32.partialorder %v6096_v0, 0.0  ;;  %vm3351_vm10 = vcmp.ge.f32.partialorder %v3276_v60, 0.0  ;;  %v3452_v39 = vsel %vm3344_vm3, %v3394_v20, %v3444_v61 }
 0x534   : > { %v3454_v62 = vsel %vm3346_vm4, %v3396_v10, %v3446_v3  ;;  %v3453_v59 = vsel %vm3345_vm5, %v3395_v5, %v3445_v23  ;;  %v3455_v6 = vsel %vm3347_vm6, %v3397_v25, %v3447_v22  ;;  %v3456_v18 = vsel %vm3348_vm7, %v3398_v49, %v3448_v42 }
 0x535   : > { %v3341_v14 = vcombine.low %v3333_v34, %v3340_v28  ;;  %v3458_v51 = vsel %vm3350_vm8, %v3400_v44, %v3450_v16  ;;  %v3457_v0 = vsel %vm3349_vm9, %v3399_v1, %v3449_v54  ;;  %v3459_v8 = vsel %vm3351_vm10, %v3401_v37, %v3451_v17 }
 0x537   : > { %v3343_v24 = vsub.f32 %v3750_v41, %v3341_v14 }
 0x539   : > { %v3464_v60 = vrot.slane %v3343_v24, %v5600_v21  ;;  %v3468_v53 = vrot.slane %v3343_v24, %v5516_v32  ;;  %v3472_v9 = vrot.slane %v3343_v24, %v5612_v35  ;;  %v3476_v57 = vrot.slane %v3343_v24, %v5519_v40 }
 0x53a   : > { %v3480_v4 = vrot.slane %v3343_v24, %v5902_v31  ;;  %v3484_v46 = vrot.slane %v3343_v24, %v5642_v29  ;;  %v3488_v43 = vrot.slane %v3343_v24, %v5908_v19  ;;  %v3492_v13 = vrot.slane %v3343_v24, %v5653_v12 }
 0x53b   : > { %v3501_v26 = vadd.f32 %v3464_v60, %v3452_v39  ;;  %v3502_v7 = vadd.f32 %v3468_v53, %v3453_v59  ;;  %v3503_v2 = vadd.f32 %v3472_v9, %v3454_v62  ;;  %v3504_v36 = vadd.f32 %v3476_v57, %v3455_v6 }
 0x53c   : > { %v3505_v15 = vadd.f32 %v3480_v4, %v3456_v18  ;;  %v3506_v21 = vadd.f32 %v3484_v46, %v3457_v0  ;;  %v3507_v38 = vadd.f32 %v3488_v43, %v3458_v51  ;;  %v3508_v32 = vadd.f32 %v3492_v13, %v3459_v8 }
 0x53d   : > { %v3509_v27 = vmax.f32 %v3501_v26, 0.0  ;;  %v3510_v35 = vmax.f32 %v3502_v7, 0.0  ;;  %v3511_v52 = vmax.f32 %v3503_v2, 0.0  ;;  %v3512_v40 = vmax.f32 %v3504_v36, 0.0 }
 0x53e   : > { %v3513_v30 = vmax.f32 %v3505_v15, 0.0  ;;  %v3514_v31 = vmax.f32 %v3506_v21, 0.0  ;;  %v3515_v29 = vmax.f32 %v3507_v38, 0.0  ;;  %v3516_v45 = vmax.f32 %v3508_v32, 0.0 }
 0x53f   : > { %v3525_v19 = vcombine.low %v3509_v27, %v3510_v35  ;;  %v3526_v58 = vcombine.low %v3511_v52, %v3512_v40 }
 0x540   : > { %v3527_v12 = vcombine.low %v3513_v30, %v3514_v31  ;;  %v3528_v11 = vcombine.low %v3515_v29, %v3516_v45 }
 0x541   : > { %v3535_v56 = vrot.slane %v3525_v19, %v6089_v63  ;;  %v3542_v47 = vrot.slane %v3526_v58, %v6089_v63 }
 0x542   : > { %v3549_v55 = vrot.slane %v3527_v12, %v6089_v63  ;;  %v3556_v48 = vrot.slane %v3528_v11, %v6089_v63 }
 0x543   : > { %v3557_v20 = vcombine.low %v3535_v56, %v3542_v47 }
 0x544   : > { %v3558_v61 = vcombine.low %v3549_v55, %v3556_v48 }
 0x545   : > { %v3565_v33 = vrot.slane %v3557_v20, %v6089_v63 }
 0x546   : > { %v3572_v10 = vrot.slane %v3558_v61, %v6089_v63 }
 0x548   : > { %v3573_v3 = vcombine.low %v3565_v33, %v3572_v10 }
 0x54a   : > { %3575 = vst [vmem:[%s4869_s5] sm:$0xff] %v3573_v3 }
 0x54b PF: > { %s22_s7 = sadd.s32 1, %s4586_s7   ;;  %s6313_s3 = sld [smem:[#allocation12_spill]] }
 0x54c   : > { %p19_p6 = scmp.ge.s32.totalorder %s22_s7, 10   ;;  %s6314_s10 = sld [smem:[#allocation13_spill]] }
 0x54d   : > { %s6315_s21 = smov %s4550_s22  ;;  %s6316_s22 = smov %s4554_s23 }
 0x54e   : > { %s6317_s23 = smov %s4804_s8  ;;  %s6318_s24 = smov %s4562_s25 }
 0x54f   : > { %s6319_s25 = smov %s4566_s26  ;;  %s6320_s26 = smov %s4730_s20 }
 0x550   : > { %s6321_s27 = smov %s4578_s29  ;;  %s6322_s28 = smov %s4582_s30 }
 0x551   : > { %s6323_s29 = smov %s6313_s3  ;;  %21 = sbr.rel (!%p19_p6) target bundleno = 15 (0xf), region = 116 }
 0x552   : > { %s6324_s30 = smov %s6314_s10 }
 0x558   :  { %3595 = vsyncpa [#allocation7], 1 }
 0x559   :  { %3597 = vsyncpa [#allocation7 + $0x1], 1 }
 0x55a   :  { %3598 = vsyncpa [#allocation9], 1 }
 0x55b   :  { %3600 = vsyncpa [#allocation9 + $0x1], 1 }

</bundles_post_ra>
